<compile_context>
chip_gen: v7x
topology: tpu7x:2x2x1
jax: 0.10.0
libtpu: 0.0.40
codegen_flags: <defaults>
</compile_context>

<pallas_src>
import math
import functools

import jax
import jax.numpy as jnp
import numpy as np
from jax.experimental import pallas as pl
from jax.experimental.pallas import tpu as pltpu

# ----------------------------- model config ---------------------------------
VOCAB_SIZE = 128
EMBED_SIZE = 128
NUM_HEADS = 4
HIDDEN_SIZE = 256
NUM_LAYERS = 2
DROPOUT = 0.1          # eval mode -> no-op
MAX_SEQ_LEN = 512
LN_EPS = 1e-5

SEQ_LEN = 8
BATCH = 2


# --------------------------- fused Pallas kernel ------------------------------
def fused_forward_kernel(tok_ref, pe_ref, emb_ref,
                         wqkv_ref, bqkv_ref, wo_ref, bo_ref,
                         w1_ref, b1_ref, w2_ref, b2_ref,
                         g1_ref, be1_ref, g2_ref, be2_ref,
                         fcw_ref, fcb_ref,
                         o_ref, x_ref, *, num_heads, num_layers):
    """Grid axis 0 = layer index. x_ref (VMEM scratch) carries activations across layers."""
    li = pl.program_id(0)
    BS, E = x_ref.shape
    S = pe_ref.shape[0]
    B = BS // S
    V = emb_ref.shape[0]
    hd = E // num_heads
    scale = 1.0 / math.sqrt(hd)
    bf16 = jnp.bfloat16

    # ---- first layer step: embedding (exact one-hot matmul) + positional encoding ----
    @pl.when(li == 0)
    def _():
        tok = tok_ref[...]                                            # (BS, 1) int32
        vocab_iota = jax.lax.broadcasted_iota(jnp.int32, (BS, V), 1)
        onehot = (vocab_iota == tok).astype(jnp.float32)              # exact 0/1
        emb = jnp.dot(onehot.astype(bf16), emb_ref[...],
                      preferred_element_type=jnp.float32)             # (BS, E) f32
        # PE add (dropout = eval mode = identity)
        x_ref[...] = (emb.reshape(B, S, E) + pe_ref[...]).reshape(BS, E)

    x = x_ref[...]                                                    # (BS, E) f32

    # ---- encoder layer `li` (weights of this layer only are VMEM-resident) ----
    wqkv = wqkv_ref[0]                                                # (E, 3E) bf16
    wo = wo_ref[0]                                                    # (E, E)  bf16
    w1 = w1_ref[0]                                                    # (E, H)  bf16
    w2 = w2_ref[0]                                                    # (H, E)  bf16

    qkv = jnp.dot(x.astype(bf16), wqkv,
                  preferred_element_type=jnp.float32) + bqkv_ref[0]   # (BS, 3E) f32
    q = qkv[:, 0 * E:1 * E]
    k = qkv[:, 1 * E:2 * E]
    v = qkv[:, 2 * E:3 * E]

    # Batched multi-head attention: pack heads into a single leading batch dim
    # (num_heads*B, S, hd), one einsum pair for all heads.
    def split_heads(t):   # (BS, E) -> (H*B, S, hd), batch ordered (h, b)
        return jnp.concatenate(
            [t[:, h * hd:(h + 1) * hd].reshape(B, S, hd) for h in range(num_heads)],
            axis=0)

    qh = split_heads(q).astype(bf16)
    kh = split_heads(k).astype(bf16)
    vh = split_heads(v).astype(bf16)

    s = jnp.einsum('nqd,nkd->nqk', qh, kh,
                   preferred_element_type=jnp.float32) * scale        # (H*B, S, S) f32
    s = s - jnp.max(s, axis=-1, keepdims=True)
    p = jnp.exp(s)
    p = p / jnp.sum(p, axis=-1, keepdims=True)                        # exact divide
    on = jnp.einsum('nqk,nkd->nqd', p.astype(bf16), vh,
                    preferred_element_type=jnp.float32)               # (H*B, S, hd) f32

    # merge heads back to lane-dense (BS, E): lanes ordered (h, d), rows (b, s)
    attn = jnp.concatenate(
        [on[h * B:(h + 1) * B].reshape(BS, hd) for h in range(num_heads)], axis=-1)

    # single full-K=128 output projection (replaces 4 accumulating K=32 dots)
    proj = jnp.dot(attn.astype(bf16), wo,
                   preferred_element_type=jnp.float32) + bo_ref[0]

    # residual + LayerNorm 1 (single-pass variance)
    h1 = x + proj
    mu = jnp.mean(h1, axis=-1, keepdims=True)
    var = jnp.mean(h1 * h1, axis=-1, keepdims=True) - mu * mu
    h1n = (h1 - mu) * jax.lax.rsqrt(var + LN_EPS) * g1_ref[0] + be1_ref[0]

    # feed-forward (ReLU), bf16 matmul inputs / f32 accumulation
    f = jnp.maximum(
        jnp.dot(h1n.astype(bf16), w1, preferred_element_type=jnp.float32) + b1_ref[0],
        0.0)
    f2 = jnp.dot(f.astype(bf16), w2, preferred_element_type=jnp.float32) + b2_ref[0]

    # residual + LayerNorm 2
    h2 = h1n + f2
    mu2 = jnp.mean(h2, axis=-1, keepdims=True)
    var2 = jnp.mean(h2 * h2, axis=-1, keepdims=True) - mu2 * mu2
    xo = (h2 - mu2) * jax.lax.rsqrt(var2 + LN_EPS) * g2_ref[0] + be2_ref[0]

    x_ref[...] = xo

    # ---- last layer step: final Linear ----
    @pl.when(li == num_layers - 1)
    def _():
        logits = jnp.dot(xo.astype(bf16), fcw_ref[...],
                         preferred_element_type=jnp.float32) + fcb_ref[...]
        o_ref[...] = logits.reshape(B, S, V)


# --------------------------- wrapper ------------------------------------------
def transformer_forward(tokens, params):
    """tokens: (S, B) int32  ->  logits: (S, B, VOCAB_SIZE) float32."""
    S, B = tokens.shape
    V, E, H = VOCAB_SIZE, EMBED_SIZE, HIDDEN_SIZE
    BS = B * S
    # rows ordered (b, s) inside the kernel; column vector of token ids
    tok_rows = jnp.transpose(tokens, (1, 0)).reshape(BS, 1).astype(jnp.int32)

    kernel = functools.partial(fused_forward_kernel,
                               num_heads=NUM_HEADS, num_layers=NUM_LAYERS)

    const2 = lambda li: (0, 0)
    const3 = lambda li: (0, 0, 0)
    perlayer = lambda li: (li, 0, 0)

    grid_spec = pltpu.PrefetchScalarGridSpec(
        num_scalar_prefetch=0,
        grid=(NUM_LAYERS,),
        in_specs=[
            pl.BlockSpec((BS, 1), const2),                 # token ids
            pl.BlockSpec((S, E), const2),                  # positional encoding (f32)
            pl.BlockSpec((V, E), const2),                  # embedding table (bf16)
            pl.BlockSpec((1, E, 3 * E), perlayer),         # wqkv  (bf16)
            pl.BlockSpec((1, 1, 3 * E), perlayer),         # bqkv  (f32)
            pl.BlockSpec((1, E, E), perlayer),             # wo    (bf16)
            pl.BlockSpec((1, 1, E), perlayer),             # bo    (f32)
            pl.BlockSpec((1, E, H), perlayer),             # w1    (bf16)
            pl.BlockSpec((1, 1, H), perlayer),             # b1    (f32)
            pl.BlockSpec((1, H, E), perlayer),             # w2    (bf16)
            pl.BlockSpec((1, 1, E), perlayer),             # b2    (f32)
            pl.BlockSpec((1, 1, E), perlayer),             # ln1 gamma
            pl.BlockSpec((1, 1, E), perlayer),             # ln1 beta
            pl.BlockSpec((1, 1, E), perlayer),             # ln2 gamma
            pl.BlockSpec((1, 1, E), perlayer),             # ln2 beta
            pl.BlockSpec((E, V), const2),                  # fc_w (bf16)
            pl.BlockSpec((1, V), const2),                  # fc_b (f32)
        ],
        out_specs=pl.BlockSpec((B, S, V), const3),
        scratch_shapes=[pltpu.VMEM((BS, E), jnp.float32)],  # activation carry
    )

    out = pl.pallas_call(
        kernel,
        out_shape=jax.ShapeDtypeStruct((B, S, V), jnp.float32),
        grid_spec=grid_spec,
        compiler_params=pltpu.CompilerParams(
            dimension_semantics=("arbitrary",),            # layer axis carries state
            vmem_limit_bytes=32 * 1024 * 1024),
    )(tok_rows, params['pe'][:S], params['embedding'],
      params['wqkv'], params['bqkv'], params['wo'], params['bo'],
      params['w1'], params['b1'], params['w2'], params['b2'],
      params['g1'], params['be1'], params['g2'], params['be2'],
      params['fc_w'], params['fc_b'])
    return jnp.transpose(out, (1, 0, 2))                   # -> (S, B, V)


# --------------------------- parameters ----------------------------------------
def make_positional_encoding(max_len, e):
    pos = jnp.arange(max_len, dtype=jnp.float32)[:, None]
    div = jnp.exp(jnp.arange(0, e, 2, dtype=jnp.float32) * (-math.log(10000.0) / e))
    pe = jnp.zeros((max_len, e), dtype=jnp.float32)
    pe = pe.at[:, 0::2].set(jnp.sin(pos * div))
    pe = pe.at[:, 1::2].set(jnp.cos(pos * div))
    return pe


def init_params(key):
    def nrm(k, shape, scale=0.02):
        return scale * jax.random.normal(k, shape, dtype=jnp.float32)

    L = NUM_LAYERS
    bf16 = jnp.bfloat16
    keys = jax.random.split(key, 4 + L)
    layer_keys = [jax.random.split(keys[4 + li], 8) for li in range(L)]

    def stack(idx, shape, scale=0.02, dtype=jnp.float32):
        return jnp.stack([nrm(layer_keys[li][idx], shape, scale)
                          for li in range(L)]).astype(dtype)

    return {
        # matmul weights stored bf16 (HBM traffic halved; MXU-native on v6e/v7x)
        'embedding': nrm(keys[0], (VOCAB_SIZE, EMBED_SIZE), 1.0).astype(bf16),
        'pe': make_positional_encoding(MAX_SEQ_LEN, EMBED_SIZE),
        'fc_w': nrm(keys[1], (EMBED_SIZE, VOCAB_SIZE)).astype(bf16),
        'fc_b': nrm(keys[2], (1, VOCAB_SIZE)),
        'wqkv': stack(0, (EMBED_SIZE, 3 * EMBED_SIZE), dtype=bf16),
        'bqkv': stack(1, (1, 3 * EMBED_SIZE)),
        'wo':   stack(2, (EMBED_SIZE, EMBED_SIZE), dtype=bf16),
        'bo':   stack(3, (1, EMBED_SIZE)),
        'w1':   stack(4, (EMBED_SIZE, HIDDEN_SIZE), dtype=bf16),
        'b1':   stack(5, (1, HIDDEN_SIZE)),
        'w2':   stack(6, (HIDDEN_SIZE, EMBED_SIZE), dtype=bf16),
        'b2':   stack(7, (1, EMBED_SIZE)),
        'g1':  jnp.ones((L, 1, EMBED_SIZE), jnp.float32),
        'be1': jnp.zeros((L, 1, EMBED_SIZE), jnp.float32),
        'g2':  jnp.ones((L, 1, EMBED_SIZE), jnp.float32),
        'be2': jnp.zeros((L, 1, EMBED_SIZE), jnp.float32),
    }


# --------------------------- pure-JAX reference ---------------------------------
def reference_forward(tokens, params):
    """f32 math using the same (bf16-rounded) weight values as the kernel."""
    S, B = tokens.shape
    E = EMBED_SIZE
    hd = E // NUM_HEADS
    f32 = lambda a: a.astype(jnp.float32)
    emb = f32(params['embedding'])[tokens]                # (S, B, E)
    x = emb + params['pe'][:S][:, None, :]
    x = jnp.transpose(x, (1, 0, 2))                       # (B, S, E)
    for li in range(NUM_LAYERS):
        x2 = x.reshape(B * S, E)
        qkv = x2 @ f32(params['wqkv'][li]) + params['bqkv'][li]
        q = qkv[:, :E].reshape(B, S, NUM_HEADS, hd)
        k = qkv[:, E:2 * E].reshape(B, S, NUM_HEADS, hd)
        v = qkv[:, 2 * E:].reshape(B, S, NUM_HEADS, hd)
        s = jnp.einsum('bqhd,bkhd->bhqk', q, k) / math.sqrt(hd)
        pmat = jax.nn.softmax(s, axis=-1)
        attn = jnp.einsum('bhqk,bkhd->bqhd', pmat, v).reshape(B * S, E)
        proj = attn @ f32(params['wo'][li]) + params['bo'][li]
        h1 = x2 + proj
        mu = jnp.mean(h1, -1, keepdims=True)
        var = jnp.mean((h1 - mu) ** 2, -1, keepdims=True)
        h1n = (h1 - mu) / jnp.sqrt(var + LN_EPS) * params['g1'][li] + params['be1'][li]
        f = jnp.maximum(h1n @ f32(params['w1'][li]) + params['b1'][li], 0.0)
        f2 = f @ f32(params['w2'][li]) + params['b2'][li]
        h2 = h1n + f2
        mu2 = jnp.mean(h2, -1, keepdims=True)
        var2 = jnp.mean((h2 - mu2) ** 2, -1, keepdims=True)
        x = ((h2 - mu2) / jnp.sqrt(var2 + LN_EPS) * params['g2'][li]
             + params['be2'][li]).reshape(B, S, E)
    out = x.reshape(B * S, E) @ f32(params['fc_w']) + params['fc_b']
    return jnp.transpose(out.reshape(B, S, VOCAB_SIZE), (1, 0, 2))


# ------------------------------------ main ---------------------------------------
if __name__ == "__main__":
    key = jax.random.PRNGKey(0)
    pkey, tkey = jax.random.split(key)
    params = init_params(pkey)

    tokens = jax.random.randint(tkey, (SEQ_LEN, BATCH), 0, VOCAB_SIZE, dtype=jnp.int32)

    fwd = jax.jit(transformer_forward)
    out = jax.block_until_ready(fwd(tokens, params))

    ref = jax.block_until_ready(reference_forward(tokens, params))

    assert out.shape == (SEQ_LEN, BATCH, VOCAB_SIZE), out.shape
    # bf16 matmul inputs in the kernel vs f32 reference math -> relaxed tolerance
    np.testing.assert_allclose(np.asarray(out), np.asarray(ref), atol=2e-2, rtol=2e-2)
    print("KERNEL_OK")
</pallas_src>

<mosaic_0001>
module attributes {stable_mosaic.version = 11 : i64} {
  func.func @fused_forward_kernel(%arg0: i32, %arg1: memref<16x1xi32, #tpu.memory_space<vmem>>, %arg2: memref<8x128xf32, #tpu.memory_space<vmem>>, %arg3: memref<128x128xbf16, #tpu.memory_space<vmem>>, %arg4: memref<1x128x384xbf16, #tpu.memory_space<vmem>>, %arg5: memref<1x1x384xf32, #tpu.memory_space<vmem>>, %arg6: memref<1x128x128xbf16, #tpu.memory_space<vmem>>, %arg7: memref<1x1x128xf32, #tpu.memory_space<vmem>>, %arg8: memref<1x128x256xbf16, #tpu.memory_space<vmem>>, %arg9: memref<1x1x256xf32, #tpu.memory_space<vmem>>, %arg10: memref<1x256x128xbf16, #tpu.memory_space<vmem>>, %arg11: memref<1x1x128xf32, #tpu.memory_space<vmem>>, %arg12: memref<1x1x128xf32, #tpu.memory_space<vmem>>, %arg13: memref<1x1x128xf32, #tpu.memory_space<vmem>>, %arg14: memref<1x1x128xf32, #tpu.memory_space<vmem>>, %arg15: memref<1x1x128xf32, #tpu.memory_space<vmem>>, %arg16: memref<128x128xbf16, #tpu.memory_space<vmem>>, %arg17: memref<1x128xf32, #tpu.memory_space<vmem>>, %arg18: memref<2x8x128xf32, #tpu.memory_space<vmem>>, %arg19: memref<16x128xf32, #tpu.memory_space<vmem>>) attributes {dimension_semantics = [#tpu.dimension_semantics<arbitrary>], iteration_bounds = array<i64: 2>, scalar_prefetch = 0 : i64, scratch_operands = 1 : i64, tpu.core_type = #tpu.core_type<tc>, window_params = [{pipeline_mode = #tpu.pipeline_mode<synchronous>, transform_indices = @transform_0, window_bounds = array<i64: 16, 1>}, {pipeline_mode = #tpu.pipeline_mode<synchronous>, transform_indices = @transform_1, window_bounds = array<i64: 8, 128>}, {pipeline_mode = #tpu.pipeline_mode<synchronous>, transform_indices = @transform_2, window_bounds = array<i64: 128, 128>}, {transform_indices = @transform_3, window_bounds = array<i64: 1, 128, 384>}, {transform_indices = @transform_4, window_bounds = array<i64: 1, 1, 384>}, {transform_indices = @transform_5, window_bounds = array<i64: 1, 128, 128>}, {transform_indices = @transform_6, window_bounds = array<i64: 1, 1, 128>}, {transform_indices = @transform_7, window_bounds = array<i64: 1, 128, 256>}, {transform_indices = @transform_8, window_bounds = array<i64: 1, 1, 256>}, {transform_indices = @transform_9, window_bounds = array<i64: 1, 256, 128>}, {transform_indices = @transform_10, window_bounds = array<i64: 1, 1, 128>}, {transform_indices = @transform_11, window_bounds = array<i64: 1, 1, 128>}, {transform_indices = @transform_12, window_bounds = array<i64: 1, 1, 128>}, {transform_indices = @transform_13, window_bounds = array<i64: 1, 1, 128>}, {transform_indices = @transform_14, window_bounds = array<i64: 1, 1, 128>}, {pipeline_mode = #tpu.pipeline_mode<synchronous>, transform_indices = @transform_15, window_bounds = array<i64: 128, 128>}, {pipeline_mode = #tpu.pipeline_mode<synchronous>, transform_indices = @transform_16, window_bounds = array<i64: 1, 128>}, {pipeline_mode = #tpu.pipeline_mode<synchronous>, transform_indices = @transform_17, window_bounds = array<i64: 2, 8, 128>}]} {
    %c0_i32 = arith.constant 0 : i32
    %0 = arith.cmpi eq, %arg0, %c0_i32 : i32
    %1 = arith.extui %0 : i1 to i32
    %c0_i32_0 = arith.constant 0 : i32
    %2 = arith.cmpi ne, %1, %c0_i32_0 : i32
    scf.if %2 {
      %c0_60 = arith.constant 0 : index
      %c0_61 = arith.constant 0 : index
      %152 = vector.load %arg1[%c0_60, %c0_61] : memref<16x1xi32, #tpu.memory_space<vmem>>, vector<16x1xi32>
      %153 = tpu.iota {dimensions = array<i32: 1>} : vector<16x128xi32>
      %154 = vector.broadcast %152 : vector<16x1xi32> to vector<16x128xi32>
      %155 = arith.cmpi eq, %153, %154 : vector<16x128xi32>
      %156 = arith.extui %155 : vector<16x128xi1> to vector<16x128xi32>
      %157 = arith.sitofp %156 : vector<16x128xi32> to vector<16x128xf32>
      %158 = arith.truncf %157 : vector<16x128xf32> to vector<16x128xbf16>
      %c0_62 = arith.constant 0 : index
      %c0_63 = arith.constant 0 : index
      %159 = vector.load %arg3[%c0_62, %c0_63] : memref<128x128xbf16, #tpu.memory_space<vmem>>, vector<128x128xbf16>
      %cst_64 = arith.constant dense<0.000000e+00> : vector<16x128xf32>
      %160 = tpu.matmul %158, %159, %cst_64 {dimension_numbers = #tpu.dot_dimension_numbers<[1], [0], [0], [1], [0, 0, 1, 1], [], []>} : vector<16x128xbf16>, vector<128x128xbf16>, vector<16x128xf32> -> vector<16x128xf32>
      %161 = vector.shape_cast %160 : vector<16x128xf32> to vector<2x8x128xf32>
      %c0_65 = arith.constant 0 : index
      %c0_66 = arith.constant 0 : index
      %162 = vector.load %arg2[%c0_65, %c0_66] : memref<8x128xf32, #tpu.memory_space<vmem>>, vector<8x128xf32>
      %163 = vector.shape_cast %162 : vector<8x128xf32> to vector<1x8x128xf32>
      %164 = vector.broadcast %163 : vector<1x8x128xf32> to vector<2x8x128xf32>
      %165 = arith.addf %161, %164 : vector<2x8x128xf32>
      %166 = vector.shape_cast %165 : vector<2x8x128xf32> to vector<16x128xf32>
      %c0_67 = arith.constant 0 : index
      %c0_68 = arith.constant 0 : index
      %167 = vector.load %arg19[%c0_67, %c0_68] : memref<16x128xf32, #tpu.memory_space<vmem>>, vector<16x128xf32>
      tpu.vector_store %arg19[%c0_67, %c0_68], %166 {strides = array<i32>} : memref<16x128xf32, #tpu.memory_space<vmem>>, vector<16x128xf32>,
    } else {
    }
    %c0 = arith.constant 0 : index
    %c0_1 = arith.constant 0 : index
    %3 = vector.load %arg19[%c0, %c0_1] : memref<16x128xf32, #tpu.memory_space<vmem>>, vector<16x128xf32>
    %c0_2 = arith.constant 0 : index
    %c0_3 = arith.constant 0 : index
    %c0_4 = arith.constant 0 : index
    %4 = vector.load %arg4[%c0_2, %c0_3, %c0_4] : memref<1x128x384xbf16, #tpu.memory_space<vmem>>, vector<1x128x384xbf16>
    %5 = vector.shape_cast %4 : vector<1x128x384xbf16> to vector<128x384xbf16>
    %c0_5 = arith.constant 0 : index
    %c0_6 = arith.constant 0 : index
    %c0_7 = arith.constant 0 : index
    %6 = vector.load %arg6[%c0_5, %c0_6, %c0_7] : memref<1x128x128xbf16, #tpu.memory_space<vmem>>, vector<1x128x128xbf16>
    %7 = vector.shape_cast %6 : vector<1x128x128xbf16> to vector<128x128xbf16>
    %c0_8 = arith.constant 0 : index
    %c0_9 = arith.constant 0 : index
    %c0_10 = arith.constant 0 : index
    %8 = vector.load %arg8[%c0_8, %c0_9, %c0_10] : memref<1x128x256xbf16, #tpu.memory_space<vmem>>, vector<1x128x256xbf16>
    %9 = vector.shape_cast %8 : vector<1x128x256xbf16> to vector<128x256xbf16>
    %c0_11 = arith.constant 0 : index
    %c0_12 = arith.constant 0 : index
    %c0_13 = arith.constant 0 : index
    %10 = vector.load %arg10[%c0_11, %c0_12, %c0_13] : memref<1x256x128xbf16, #tpu.memory_space<vmem>>, vector<1x256x128xbf16>
    %11 = vector.shape_cast %10 : vector<1x256x128xbf16> to vector<256x128xbf16>
    %12 = arith.truncf %3 : vector<16x128xf32> to vector<16x128xbf16>
    %cst = arith.constant dense<0.000000e+00> : vector<16x384xf32>
    %13 = tpu.matmul %12, %5, %cst {dimension_numbers = #tpu.dot_dimension_numbers<[1], [0], [0], [1], [0, 0, 1, 1], [], []>} : vector<16x128xbf16>, vector<128x384xbf16>, vector<16x384xf32> -> vector<16x384xf32>
    %c0_14 = arith.constant 0 : index
    %c0_15 = arith.constant 0 : index
    %c0_16 = arith.constant 0 : index
    %14 = vector.load %arg5[%c0_14, %c0_15, %c0_16] : memref<1x1x384xf32, #tpu.memory_space<vmem>>, vector<1x1x384xf32>
    %15 = vector.shape_cast %14 : vector<1x1x384xf32> to vector<1x384xf32>
    %16 = vector.broadcast %15 : vector<1x384xf32> to vector<16x384xf32>
    %17 = arith.addf %13, %16 : vector<16x384xf32>
    %18 = vector.extract_strided_slice %17 {offsets = [0, 0], sizes = [16, 128], strides = [1, 1]} : vector<16x384xf32> to vector<16x128xf32>
    %19 = vector.extract_strided_slice %17 {offsets = [0, 128], sizes = [16, 128], strides = [1, 1]} : vector<16x384xf32> to vector<16x128xf32>
    %20 = vector.extract_strided_slice %17 {offsets = [0, 256], sizes = [16, 128], strides = [1, 1]} : vector<16x384xf32> to vector<16x128xf32>
    %21 = vector.extract_strided_slice %18 {offsets = [0, 0], sizes = [16, 32], strides = [1, 1]} : vector<16x128xf32> to vector<16x32xf32>
    %22 = vector.shape_cast %21 : vector<16x32xf32> to vector<2x8x32xf32>
    %23 = vector.extract_strided_slice %18 {offsets = [0, 32], sizes = [16, 32], strides = [1, 1]} : vector<16x128xf32> to vector<16x32xf32>
    %24 = vector.shape_cast %23 : vector<16x32xf32> to vector<2x8x32xf32>
    %25 = vector.extract_strided_slice %18 {offsets = [0, 64], sizes = [16, 32], strides = [1, 1]} : vector<16x128xf32> to vector<16x32xf32>
    %26 = vector.shape_cast %25 : vector<16x32xf32> to vector<2x8x32xf32>
    %27 = vector.extract_strided_slice %18 {offsets = [0, 96], sizes = [16, 32], strides = [1, 1]} : vector<16x128xf32> to vector<16x32xf32>
    %28 = vector.shape_cast %27 : vector<16x32xf32> to vector<2x8x32xf32>
    %29 = tpu.concatenate %22, %24, %26, %28 in 0 : vector<2x8x32xf32>, vector<2x8x32xf32>, vector<2x8x32xf32>, vector<2x8x32xf32> -> vector<8x8x32xf32>
    %30 = arith.truncf %29 : vector<8x8x32xf32> to vector<8x8x32xbf16>
    %31 = vector.extract_strided_slice %19 {offsets = [0, 0], sizes = [16, 32], strides = [1, 1]} : vector<16x128xf32> to vector<16x32xf32>
    %32 = vector.shape_cast %31 : vector<16x32xf32> to vector<2x8x32xf32>
    %33 = vector.extract_strided_slice %19 {offsets = [0, 32], sizes = [16, 32], strides = [1, 1]} : vector<16x128xf32> to vector<16x32xf32>
    %34 = vector.shape_cast %33 : vector<16x32xf32> to vector<2x8x32xf32>
    %35 = vector.extract_strided_slice %19 {offsets = [0, 64], sizes = [16, 32], strides = [1, 1]} : vector<16x128xf32> to vector<16x32xf32>
    %36 = vector.shape_cast %35 : vector<16x32xf32> to vector<2x8x32xf32>
    %37 = vector.extract_strided_slice %19 {offsets = [0, 96], sizes = [16, 32], strides = [1, 1]} : vector<16x128xf32> to vector<16x32xf32>
    %38 = vector.shape_cast %37 : vector<16x32xf32> to vector<2x8x32xf32>
    %39 = tpu.concatenate %32, %34, %36, %38 in 0 : vector<2x8x32xf32>, vector<2x8x32xf32>, vector<2x8x32xf32>, vector<2x8x32xf32> -> vector<8x8x32xf32>
    %40 = arith.truncf %39 : vector<8x8x32xf32> to vector<8x8x32xbf16>
    %41 = vector.extract_strided_slice %20 {offsets = [0, 0], sizes = [16, 32], strides = [1, 1]} : vector<16x128xf32> to vector<16x32xf32>
    %42 = vector.shape_cast %41 : vector<16x32xf32> to vector<2x8x32xf32>
    %43 = vector.extract_strided_slice %20 {offsets = [0, 32], sizes = [16, 32], strides = [1, 1]} : vector<16x128xf32> to vector<16x32xf32>
    %44 = vector.shape_cast %43 : vector<16x32xf32> to vector<2x8x32xf32>
    %45 = vector.extract_strided_slice %20 {offsets = [0, 64], sizes = [16, 32], strides = [1, 1]} : vector<16x128xf32> to vector<16x32xf32>
    %46 = vector.shape_cast %45 : vector<16x32xf32> to vector<2x8x32xf32>
    %47 = vector.extract_strided_slice %20 {offsets = [0, 96], sizes = [16, 32], strides = [1, 1]} : vector<16x128xf32> to vector<16x32xf32>
    %48 = vector.shape_cast %47 : vector<16x32xf32> to vector<2x8x32xf32>
    %49 = tpu.concatenate %42, %44, %46, %48 in 0 : vector<2x8x32xf32>, vector<2x8x32xf32>, vector<2x8x32xf32>, vector<2x8x32xf32> -> vector<8x8x32xf32>
    %50 = arith.truncf %49 : vector<8x8x32xf32> to vector<8x8x32xbf16>
    "tpu.trace_start"() <{level = 10 : i32, message = "nqd,nkd->nqk"}> : () -> ()
    %cst_17 = arith.constant dense<0.000000e+00> : vector<8x8x8xf32>
    %51 = tpu.matmul %30, %40, %cst_17 {dimension_numbers = #tpu.dot_dimension_numbers<[2], [2], [1], [1], [0, 0, 0, 1, 1, 1], [0], [0]>} : vector<8x8x32xbf16>, vector<8x8x32xbf16>, vector<8x8x8xf32> -> vector<8x8x8xf32>
    "tpu.trace_stop"() : () -> ()
    %cst_18 = arith.constant 0.176776692 : f32
    %52 = vector.broadcast %cst_18 : f32 to vector<8x8x8xf32>
    %53 = arith.mulf %51, %52 : vector<8x8x8xf32>
    %cst_19 = arith.constant dense<0xFF800000> : vector<8x8xf32>
    %54 = vector.multi_reduction <maximumf>, %53, %cst_19 [2] : vector<8x8x8xf32> to vector<8x8xf32>
    %55 = vector.shape_cast %54 : vector<8x8xf32> to vector<8x8x1xf32>
    %56 = vector.broadcast %55 : vector<8x8x1xf32> to vector<8x8x8xf32>
    %57 = arith.subf %53, %56 : vector<8x8x8xf32>
    %58 = math.exp %57 : vector<8x8x8xf32>
    %cst_20 = arith.constant dense<0.000000e+00> : vector<8x8xf32>
    %59 = vector.multi_reduction <add>, %58, %cst_20 [2] : vector<8x8x8xf32> to vector<8x8xf32>
    %60 = vector.shape_cast %59 : vector<8x8xf32> to vector<8x8x1xf32>
    %61 = vector.broadcast %60 : vector<8x8x1xf32> to vector<8x8x8xf32>
    %62 = arith.divf %58, %61 : vector<8x8x8xf32>
    %63 = arith.truncf %62 : vector<8x8x8xf32> to vector<8x8x8xbf16>
    "tpu.trace_start"() <{level = 10 : i32, message = "nqk,nkd->nqd"}> : () -> ()
    %cst_21 = arith.constant dense<0.000000e+00> : vector<8x8x32xf32>
    %64 = tpu.matmul %63, %50, %cst_21 {dimension_numbers = #tpu.dot_dimension_numbers<[2], [1], [1], [2], [0, 0, 0, 1, 1, 2], [0], [0]>} : vector<8x8x8xbf16>, vector<8x8x32xbf16>, vector<8x8x32xf32> -> vector<8x8x32xf32>
    "tpu.trace_stop"() : () -> ()
    %65 = vector.extract_strided_slice %64 {offsets = [0, 0, 0], sizes = [2, 8, 32], strides = [1, 1, 1]} : vector<8x8x32xf32> to vector<2x8x32xf32>
    %66 = vector.shape_cast %65 : vector<2x8x32xf32> to vector<16x32xf32>
    %67 = vector.extract_strided_slice %64 {offsets = [2, 0, 0], sizes = [2, 8, 32], strides = [1, 1, 1]} : vector<8x8x32xf32> to vector<2x8x32xf32>
    %68 = vector.shape_cast %67 : vector<2x8x32xf32> to vector<16x32xf32>
    %69 = vector.extract_strided_slice %64 {offsets = [4, 0, 0], sizes = [2, 8, 32], strides = [1, 1, 1]} : vector<8x8x32xf32> to vector<2x8x32xf32>
    %70 = vector.shape_cast %69 : vector<2x8x32xf32> to vector<16x32xf32>
    %71 = vector.extract_strided_slice %64 {offsets = [6, 0, 0], sizes = [2, 8, 32], strides = [1, 1, 1]} : vector<8x8x32xf32> to vector<2x8x32xf32>
    %72 = vector.shape_cast %71 : vector<2x8x32xf32> to vector<16x32xf32>
    %73 = tpu.concatenate %66, %68, %70, %72 in 1 : vector<16x32xf32>, vector<16x32xf32>, vector<16x32xf32>, vector<16x32xf32> -> vector<16x128xf32>
    %74 = arith.truncf %73 : vector<16x128xf32> to vector<16x128xbf16>
    %cst_22 = arith.constant dense<0.000000e+00> : vector<16x128xf32>
    %75 = tpu.matmul %74, %7, %cst_22 {dimension_numbers = #tpu.dot_dimension_numbers<[1], [0], [0], [1], [0, 0, 1, 1], [], []>} : vector<16x128xbf16>, vector<128x128xbf16>, vector<16x128xf32> -> vector<16x128xf32>
    %c0_23 = arith.constant 0 : index
    %c0_24 = arith.constant 0 : index
    %c0_25 = arith.constant 0 : index
    %76 = vector.load %arg7[%c0_23, %c0_24, %c0_25] : memref<1x1x128xf32, #tpu.memory_space<vmem>>, vector<1x1x128xf32>
    %77 = vector.shape_cast %76 : vector<1x1x128xf32> to vector<1x128xf32>
    %78 = vector.broadcast %77 : vector<1x128xf32> to vector<16x128xf32>
    %79 = arith.addf %75, %78 : vector<16x128xf32>
    %80 = arith.addf %3, %79 : vector<16x128xf32>
    %cst_26 = arith.constant dense<0.000000e+00> : vector<16xf32>
    %81 = vector.multi_reduction <add>, %80, %cst_26 [1] : vector<16x128xf32> to vector<16xf32>
    %82 = vector.shape_cast %81 : vector<16xf32> to vector<16x1xf32>
    %cst_27 = arith.constant 1.280000e+02 : f32
    %83 = vector.broadcast %cst_27 : f32 to vector<16x1xf32>
    %84 = arith.divf %82, %83 : vector<16x1xf32>
    %85 = arith.mulf %80, %80 : vector<16x128xf32>
    %cst_28 = arith.constant dense<0.000000e+00> : vector<16xf32>
    %86 = vector.multi_reduction <add>, %85, %cst_28 [1] : vector<16x128xf32> to vector<16xf32>
    %87 = vector.shape_cast %86 : vector<16xf32> to vector<16x1xf32>
    %cst_29 = arith.constant 1.280000e+02 : f32
    %88 = vector.broadcast %cst_29 : f32 to vector<16x1xf32>
    %89 = arith.divf %87, %88 : vector<16x1xf32>
    %90 = arith.mulf %84, %84 : vector<16x1xf32>
    %91 = arith.subf %89, %90 : vector<16x1xf32>
    %92 = vector.broadcast %84 : vector<16x1xf32> to vector<16x128xf32>
    %93 = arith.subf %80, %92 : vector<16x128xf32>
    %cst_30 = arith.constant 9.99999974E-6 : f32
    %94 = vector.broadcast %cst_30 : f32 to vector<16x1xf32>
    %95 = arith.addf %91, %94 : vector<16x1xf32>
    %96 = math.rsqrt %95 : vector<16x1xf32>
    %97 = vector.broadcast %96 : vector<16x1xf32> to vector<16x128xf32>
    %98 = arith.mulf %93, %97 : vector<16x128xf32>
    %c0_31 = arith.constant 0 : index
    %c0_32 = arith.constant 0 : index
    %c0_33 = arith.constant 0 : index
    %99 = vector.load %arg12[%c0_31, %c0_32, %c0_33] : memref<1x1x128xf32, #tpu.memory_space<vmem>>, vector<1x1x128xf32>
    %100 = vector.shape_cast %99 : vector<1x1x128xf32> to vector<1x128xf32>
    %101 = vector.broadcast %100 : vector<1x128xf32> to vector<16x128xf32>
    %102 = arith.mulf %98, %101 : vector<16x128xf32>
    %c0_34 = arith.constant 0 : index
    %c0_35 = arith.constant 0 : index
    %c0_36 = arith.constant 0 : index
    %103 = vector.load %arg13[%c0_34, %c0_35, %c0_36] : memref<1x1x128xf32, #tpu.memory_space<vmem>>, vector<1x1x128xf32>
    %104 = vector.shape_cast %103 : vector<1x1x128xf32> to vector<1x128xf32>
    %105 = vector.broadcast %104 : vector<1x128xf32> to vector<16x128xf32>
    %106 = arith.addf %102, %105 : vector<16x128xf32>
    %107 = arith.truncf %106 : vector<16x128xf32> to vector<16x128xbf16>
    %cst_37 = arith.constant dense<0.000000e+00> : vector<16x256xf32>
    %108 = tpu.matmul %107, %9, %cst_37 {dimension_numbers = #tpu.dot_dimension_numbers<[1], [0], [0], [1], [0, 0, 1, 1], [], []>} : vector<16x128xbf16>, vector<128x256xbf16>, vector<16x256xf32> -> vector<16x256xf32>
    %c0_38 = arith.constant 0 : index
    %c0_39 = arith.constant 0 : index
    %c0_40 = arith.constant 0 : index
    %109 = vector.load %arg9[%c0_38, %c0_39, %c0_40] : memref<1x1x256xf32, #tpu.memory_space<vmem>>, vector<1x1x256xf32>
    %110 = vector.shape_cast %109 : vector<1x1x256xf32> to vector<1x256xf32>
    %111 = vector.broadcast %110 : vector<1x256xf32> to vector<16x256xf32>
    %112 = arith.addf %108, %111 : vector<16x256xf32>
    %cst_41 = arith.constant 0.000000e+00 : f32
    %113 = vector.broadcast %cst_41 : f32 to vector<16x256xf32>
    %114 = arith.maximumf %112, %113 : vector<16x256xf32>
    %115 = arith.truncf %114 : vector<16x256xf32> to vector<16x256xbf16>
    %cst_42 = arith.constant dense<0.000000e+00> : vector<16x128xf32>
    %116 = tpu.matmul %115, %11, %cst_42 {dimension_numbers = #tpu.dot_dimension_numbers<[1], [0], [0], [1], [0, 0, 1, 1], [], []>} : vector<16x256xbf16>, vector<256x128xbf16>, vector<16x128xf32> -> vector<16x128xf32>
    %c0_43 = arith.constant 0 : index
    %c0_44 = arith.constant 0 : index
    %c0_45 = arith.constant 0 : index
    %117 = vector.load %arg11[%c0_43, %c0_44, %c0_45] : memref<1x1x128xf32, #tpu.memory_space<vmem>>, vector<1x1x128xf32>
    %118 = vector.shape_cast %117 : vector<1x1x128xf32> to vector<1x128xf32>
    %119 = vector.broadcast %118 : vector<1x128xf32> to vector<16x128xf32>
    %120 = arith.addf %116, %119 : vector<16x128xf32>
    %121 = arith.addf %106, %120 : vector<16x128xf32>
    %cst_46 = arith.constant dense<0.000000e+00> : vector<16xf32>
    %122 = vector.multi_reduction <add>, %121, %cst_46 [1] : vector<16x128xf32> to vector<16xf32>
    %123 = vector.shape_cast %122 : vector<16xf32> to vector<16x1xf32>
    %cst_47 = arith.constant 1.280000e+02 : f32
    %124 = vector.broadcast %cst_47 : f32 to vector<16x1xf32>
    %125 = arith.divf %123, %124 : vector<16x1xf32>
    %126 = arith.mulf %121, %121 : vector<16x128xf32>
    %cst_48 = arith.constant dense<0.000000e+00> : vector<16xf32>
    %127 = vector.multi_reduction <add>, %126, %cst_48 [1] : vector<16x128xf32> to vector<16xf32>
    %128 = vector.shape_cast %127 : vector<16xf32> to vector<16x1xf32>
    %cst_49 = arith.constant 1.280000e+02 : f32
    %129 = vector.broadcast %cst_49 : f32 to vector<16x1xf32>
    %130 = arith.divf %128, %129 : vector<16x1xf32>
    %131 = arith.mulf %125, %125 : vector<16x1xf32>
    %132 = arith.subf %130, %131 : vector<16x1xf32>
    %133 = vector.broadcast %125 : vector<16x1xf32> to vector<16x128xf32>
    %134 = arith.subf %121, %133 : vector<16x128xf32>
    %cst_50 = arith.constant 9.99999974E-6 : f32
    %135 = vector.broadcast %cst_50 : f32 to vector<16x1xf32>
    %136 = arith.addf %132, %135 : vector<16x1xf32>
    %137 = math.rsqrt %136 : vector<16x1xf32>
    %138 = vector.broadcast %137 : vector<16x1xf32> to vector<16x128xf32>
    %139 = arith.mulf %134, %138 : vector<16x128xf32>
    %c0_51 = arith.constant 0 : index
    %c0_52 = arith.constant 0 : index
    %c0_53 = arith.constant 0 : index
    %140 = vector.load %arg14[%c0_51, %c0_52, %c0_53] : memref<1x1x128xf32, #tpu.memory_space<vmem>>, vector<1x1x128xf32>
    %141 = vector.shape_cast %140 : vector<1x1x128xf32> to vector<1x128xf32>
    %142 = vector.broadcast %141 : vector<1x128xf32> to vector<16x128xf32>
    %143 = arith.mulf %139, %142 : vector<16x128xf32>
    %c0_54 = arith.constant 0 : index
    %c0_55 = arith.constant 0 : index
    %c0_56 = arith.constant 0 : index
    %144 = vector.load %arg15[%c0_54, %c0_55, %c0_56] : memref<1x1x128xf32, #tpu.memory_space<vmem>>, vector<1x1x128xf32>
    %145 = vector.shape_cast %144 : vector<1x1x128xf32> to vector<1x128xf32>
    %146 = vector.broadcast %145 : vector<1x128xf32> to vector<16x128xf32>
    %147 = arith.addf %143, %146 : vector<16x128xf32>
    %c0_57 = arith.constant 0 : index
    %c0_58 = arith.constant 0 : index
    %148 = vector.load %arg19[%c0_57, %c0_58] : memref<16x128xf32, #tpu.memory_space<vmem>>, vector<16x128xf32>
    tpu.vector_store %arg19[%c0_57, %c0_58], %147 {strides = array<i32>} : memref<16x128xf32, #tpu.memory_space<vmem>>, vector<16x128xf32>,
    %c1_i32 = arith.constant 1 : i32
    %149 = arith.cmpi eq, %arg0, %c1_i32 : i32
    %150 = arith.extui %149 : i1 to i32
    %c0_i32_59 = arith.constant 0 : i32
    %151 = arith.cmpi ne, %150, %c0_i32_59 : i32
    scf.if %151 {
      %152 = arith.truncf %147 : vector<16x128xf32> to vector<16x128xbf16>
      %c0_60 = arith.constant 0 : index
      %c0_61 = arith.constant 0 : index
      %153 = vector.load %arg16[%c0_60, %c0_61] : memref<128x128xbf16, #tpu.memory_space<vmem>>, vector<128x128xbf16>
      %cst_62 = arith.constant dense<0.000000e+00> : vector<16x128xf32>
      %154 = tpu.matmul %152, %153, %cst_62 {dimension_numbers = #tpu.dot_dimension_numbers<[1], [0], [0], [1], [0, 0, 1, 1], [], []>} : vector<16x128xbf16>, vector<128x128xbf16>, vector<16x128xf32> -> vector<16x128xf32>
      %c0_63 = arith.constant 0 : index
      %c0_64 = arith.constant 0 : index
      %155 = vector.load %arg17[%c0_63, %c0_64] : memref<1x128xf32, #tpu.memory_space<vmem>>, vector<1x128xf32>
      %156 = vector.broadcast %155 : vector<1x128xf32> to vector<16x128xf32>
      %157 = arith.addf %154, %156 : vector<16x128xf32>
      %158 = vector.shape_cast %157 : vector<16x128xf32> to vector<2x8x128xf32>
      %c0_65 = arith.constant 0 : index
      %c0_66 = arith.constant 0 : index
      %c0_67 = arith.constant 0 : index
      %159 = vector.load %arg18[%c0_65, %c0_66, %c0_67] : memref<2x8x128xf32, #tpu.memory_space<vmem>>, vector<2x8x128xf32>
      tpu.vector_store %arg18[%c0_65, %c0_66, %c0_67], %158 {strides = array<i32>} : memref<2x8x128xf32, #tpu.memory_space<vmem>>, vector<2x8x128xf32>,
    } else {
    }
    return
  }
  func.func @transform_0(%arg0: i32) -> (i32, i32) {
    %c0_i32 = arith.constant 0 : i32
    %c0_i32_0 = arith.constant 0 : i32
    %c0_i32_1 = arith.constant 0 : i32
    return %c0_i32, %c0_i32_0 : i32, i32
  }
  func.func @transform_1(%arg0: i32) -> (i32, i32) {
    %c0_i32 = arith.constant 0 : i32
    %c0_i32_0 = arith.constant 0 : i32
    %c0_i32_1 = arith.constant 0 : i32
    return %c0_i32, %c0_i32_0 : i32, i32
  }
  func.func @transform_2(%arg0: i32) -> (i32, i32) {
    %c0_i32 = arith.constant 0 : i32
    %c0_i32_0 = arith.constant 0 : i32
    %c0_i32_1 = arith.constant 0 : i32
    return %c0_i32, %c0_i32_0 : i32, i32
  }
  func.func @transform_3(%arg0: i32) -> (i32, i32, i32) {
    %c0_i32 = arith.constant 0 : i32
    %c0_i32_0 = arith.constant 0 : i32
    %c0_i32_1 = arith.constant 0 : i32
    return %arg0, %c0_i32, %c0_i32_0 : i32, i32, i32
  }
  func.func @transform_4(%arg0: i32) -> (i32, i32, i32) {
    %c0_i32 = arith.constant 0 : i32
    %c0_i32_0 = arith.constant 0 : i32
    %c0_i32_1 = arith.constant 0 : i32
    return %arg0, %c0_i32, %c0_i32_0 : i32, i32, i32
  }
  func.func @transform_5(%arg0: i32) -> (i32, i32, i32) {
    %c0_i32 = arith.constant 0 : i32
    %c0_i32_0 = arith.constant 0 : i32
    %c0_i32_1 = arith.constant 0 : i32
    return %arg0, %c0_i32, %c0_i32_0 : i32, i32, i32
  }
  func.func @transform_6(%arg0: i32) -> (i32, i32, i32) {
    %c0_i32 = arith.constant 0 : i32
    %c0_i32_0 = arith.constant 0 : i32
    %c0_i32_1 = arith.constant 0 : i32
    return %arg0, %c0_i32, %c0_i32_0 : i32, i32, i32
  }
  func.func @transform_7(%arg0: i32) -> (i32, i32, i32) {
    %c0_i32 = arith.constant 0 : i32
    %c0_i32_0 = arith.constant 0 : i32
    %c0_i32_1 = arith.constant 0 : i32
    return %arg0, %c0_i32, %c0_i32_0 : i32, i32, i32
  }
  func.func @transform_8(%arg0: i32) -> (i32, i32, i32) {
    %c0_i32 = arith.constant 0 : i32
    %c0_i32_0 = arith.constant 0 : i32
    %c0_i32_1 = arith.constant 0 : i32
    return %arg0, %c0_i32, %c0_i32_0 : i32, i32, i32
  }
  func.func @transform_9(%arg0: i32) -> (i32, i32, i32) {
    %c0_i32 = arith.constant 0 : i32
    %c0_i32_0 = arith.constant 0 : i32
    %c0_i32_1 = arith.constant 0 : i32
    return %arg0, %c0_i32, %c0_i32_0 : i32, i32, i32
  }
  func.func @transform_10(%arg0: i32) -> (i32, i32, i32) {
    %c0_i32 = arith.constant 0 : i32
    %c0_i32_0 = arith.constant 0 : i32
    %c0_i32_1 = arith.constant 0 : i32
    return %arg0, %c0_i32, %c0_i32_0 : i32, i32, i32
  }
  func.func @transform_11(%arg0: i32) -> (i32, i32, i32) {
    %c0_i32 = arith.constant 0 : i32
    %c0_i32_0 = arith.constant 0 : i32
    %c0_i32_1 = arith.constant 0 : i32
    return %arg0, %c0_i32, %c0_i32_0 : i32, i32, i32
  }
  func.func @transform_12(%arg0: i32) -> (i32, i32, i32) {
    %c0_i32 = arith.constant 0 : i32
    %c0_i32_0 = arith.constant 0 : i32
    %c0_i32_1 = arith.constant 0 : i32
    return %arg0, %c0_i32, %c0_i32_0 : i32, i32, i32
  }
  func.func @transform_13(%arg0: i32) -> (i32, i32, i32) {
    %c0_i32 = arith.constant 0 : i32
    %c0_i32_0 = arith.constant 0 : i32
    %c0_i32_1 = arith.constant 0 : i32
    return %arg0, %c0_i32, %c0_i32_0 : i32, i32, i32
  }
  func.func @transform_14(%arg0: i32) -> (i32, i32, i32) {
    %c0_i32 = arith.constant 0 : i32
    %c0_i32_0 = arith.constant 0 : i32
    %c0_i32_1 = arith.constant 0 : i32
    return %arg0, %c0_i32, %c0_i32_0 : i32, i32, i32
  }
  func.func @transform_15(%arg0: i32) -> (i32, i32) {
    %c0_i32 = arith.constant 0 : i32
    %c0_i32_0 = arith.constant 0 : i32
    %c0_i32_1 = arith.constant 0 : i32
    return %c0_i32, %c0_i32_0 : i32, i32
  }
  func.func @transform_16(%arg0: i32) -> (i32, i32) {
    %c0_i32 = arith.constant 0 : i32
    %c0_i32_0 = arith.constant 0 : i32
    %c0_i32_1 = arith.constant 0 : i32
    return %c0_i32, %c0_i32_0 : i32, i32
  }
  func.func @transform_17(%arg0: i32) -> (i32, i32, i32) {
    %c0_i32 = arith.constant 0 : i32
    %c0_i32_0 = arith.constant 0 : i32
    %c0_i32_1 = arith.constant 0 : i32
    %c0_i32_2 = arith.constant 0 : i32
    return %c0_i32, %c0_i32_0, %c0_i32_1 : i32, i32, i32
  }
}

</mosaic_0001>

<bundles_post_ra>
// kernel: transformer_forward.1
= control target key start
LH: loop header
LB: loop body
LE: loop exit
PB: predicated region body
PF: predicated region fallthrough
CT: control target
= control target key end

     0   :  { %s5258_s0 = inlined_call_operand.vmem [shape: s32[16,1], index: 0, kind: input, shape index: {}]   ;;  %s5259_s1 = inlined_call_operand.vmem [shape: f32[8,128], index: 1, kind: input, shape index: {}]   ;;  %s5260_s2 = inlined_call_operand.vmem [shape: bf16[128,128], index: 2, kind: input, shape index: {}]   ;;  %s5261_s3 = inlined_call_operand.hbm [shape: bf16[2,128,384], index: 3, kind: input, shape index: {}]   ;;  %s5262_s4 = inlined_call_operand.hbm [shape: f32[2,1,384], index: 4, kind: input, shape index: {}]   ;;  %s5263_s5 = inlined_call_operand.hbm [shape: bf16[2,128,128], index: 5, kind: input, shape index: {}]   ;;  %s5264_s6 = inlined_call_operand.hbm [shape: f32[2,1,128], index: 6, kind: input, shape index: {}]   ;;  %s5265_s7 = inlined_call_operand.hbm [shape: bf16[2,128,256], index: 7, kind: input, shape index: {}]   ;;  %s5266_s8 = inlined_call_operand.hbm [shape: f32[2,1,256], index: 8, kind: input, shape index: {}]   ;;  %s5267_s9 = inlined_call_operand.hbm [shape: bf16[2,256,128], index: 9, kind: input, shape index: {}]   ;;  %s5268_s10 = inlined_call_operand.hbm [shape: f32[2,1,128], index: 10, kind: input, shape index: {}]   ;;  %s5269_s11 = inlined_call_operand.vmem [shape: f32[2,1,128], index: 11, kind: input, shape index: {}]   ;;  %s5270_s12 = inlined_call_operand.hbm [shape: f32[2,1,128], index: 12, kind: input, shape index: {}]   ;;  %s5271_s13 = inlined_call_operand.vmem [shape: f32[2,1,128], index: 13, kind: input, shape index: {}]   ;;  %s5272_s14 = inlined_call_operand.hbm [shape: f32[2,1,128], index: 14, kind: input, shape index: {}]   ;;  %s5273_s15 = inlined_call_operand.hbm [shape: bf16[128,128], index: 15, kind: input, shape index: {}]   ;;  %s5274_s16 = inlined_call_operand.vmem [shape: f32[1,128], index: 16, kind: input, shape index: {}]   ;;  %s5275_s17 = inlined_call_operand.vmem [shape: f32[2,8,128], index: 17, kind: output, shape index: {}]  }
   0x1   :  { %5300 = sst [smem:[#allocation32_spill]] %s5258_s0 }
   0x2   :  { %5301 = sst [smem:[#allocation33_spill]] %s5259_s1 }
   0x3   :  { %5302 = sst [smem:[#allocation34_spill]] %s5260_s2 }
   0x4   :  { %5303 = sst [smem:[#allocation35_spill]] %s5261_s3 }
   0x5   :  { %5304 = sst [smem:[#allocation36_spill]] %s5262_s4 }
   0x6   :  { %5305 = sst [smem:[#allocation37_spill]] %s5269_s11 }
   0x7   :  { %5306 = sst [smem:[#allocation38_spill]] %s5271_s13 }
   0x8   :  { %5307 = sst [smem:[#allocation39_spill]] %s5273_s15 }
   0x9   :  { %5308 = sst [smem:[#allocation40_spill]] %s5274_s16 }
   0xa   :  { %5309 = sst [smem:[#allocation41_spill]] %s5275_s17 }
   0xb   :  { %22 = vsyncpa [#allocation4], 0 }
   0xc   :  { %24 = vsyncpa [#allocation4 + $0x1], 0 }
   0xd   :  { %25 = vsyncpa [#allocation6], 0 }
   0xe   :  { %27 = vsyncpa [#allocation6 + $0x1], 0 }
   0xf   :  { %28 = vsyncpa [#allocation9], 0 }
  0x10   :  { %30 = vsyncpa [#allocation9 + $0x1], 0 }
  0x11   :  { %31 = vsyncpa [#allocation12], 0 }
  0x12   :  { %33 = vsyncpa [#allocation12 + $0x1], 0 }
  0x13   :  { %34 = vsyncpa [#allocation15], 0 }
  0x14   :  { %36 = vsyncpa [#allocation15 + $0x1], 0 }
  0x15   :  { %37 = vsyncpa [#allocation18], 0 }
  0x16   :  { %39 = vsyncpa [#allocation18 + $0x1], 0  ;;  %s4408_s24 = smov 0   ;;  %s4410_s25 = smov 0  }
  0x17   :  { %s4412_s26 = smov 0   ;;  %s4414_s27 = smov 0  }
  0x18 LB: > { %5310 = sst [smem:[#allocation27_spill]] %s4283_s26  ;;  %s4427_s28 = sadd.s32 4294967295, %s4287_s27   ;;  %s4287_s27 = sphi %s4414_s27, %s5355_s27   ;;  %s4283_s26 = sphi %s4412_s26, %s5357_s26   ;;  %s4279_s25 = sphi %s4410_s25, %s5359_s25   ;;  %s4275_s24 = sphi %s4408_s24, %s5358_s24  }
  0x19   : > { %5311 = sst [smem:[#allocation28_spill]] %s4427_s28  ;;  %s4430_s29 = sadd.s32 1, %s4287_s27  }
  0x1a   : > { %5312 = sst [smem:[#allocation29_spill]] %s4430_s29  ;;  %s112_s0 = ssub.s32 %s4287_s27, %s4430_s29 }
  0x1b   : > { %s115_s30 = sadd.s32 1, %s4283_s26  ;;  %p113_p0 = scmp.eq.s32.totalorder %s112_s0, 0 }
  0x1c   : > { %p122_p1 = scmp.ne.s32.totalorder %s4283_s26, %s4279_s25  ;;  %p123_p2 = scmp.eq.s32.totalorder %s4287_s27, 0 }
  0x1d   : > { %p128_p3 = scmp.ne.s32.totalorder %s4279_s25, %s4275_s24  ;;  %p5282_p5 = scmp.eq.s32.totalorder %s4427_s28, 0 }
  0x1e   : > { %s4440_s18 = scalar_select %p113_p0, %s4283_s26, %s115_s30  }
  0x1f   : > { %p4442_p4 = por %p123_p2, %p122_p1  ;;  %p3182_p6 = scmp.ge.s32.totalorder %s4287_s27, 1 }
  0x20   : > { %5313 = sst [smem:[#allocation30_spill]] %s4440_s18  ;;  %p488_p7 = scmp.lt.s32.totalorder %s4287_s27, 3 }
  0x21   : > { %p4451_p8 = por %p5282_p5, %p128_p3  ;;  %s4289_s21 = smov [#allocation19]  }
  0x22   : > { %p4456_p10 = pnand %p3182_p6, %p488_p7  ;;  %s509_s22 = sshll.u32 %s4289_s21, 4  ;;  %s510_s22 = int_to_ptr.vmem [resolvable:$true] %s509_s22 }
  0x23   : > { %s5315_s1 = scalar_select %p4451_p8, 1, 0 }
  0x24   : > { %s5317_s20 = scalar_select %p4456_p10, 1, 0 }
  0x25   : > { %5316 = sst [smem:[#allocation31_spill]] %s5315_s1  ;;  %p3620_p11 = pneg %p4456_p10 }
  0x26   : > { %p3656_p13 = scmp.lt.s32.totalorder %s4287_s27, 2  ;;  %s4470_s24 = sand.u32 1, %s4283_s26  }
  0x27   : > { %p4464_p12 = pnand %p3620_p11, %p5282_p5  ;;  %s4473_s0 = sand.u32 1, %s4287_s27  }
  0x28   : > { %p4477_p0 = pnand %p3656_p13, %p4442_p4  ;;  %s5320_s15 = sld [smem:[#allocation39_spill]] }
  0x29   : > { %p3903_p2 = pneg %p4464_p12 }
  0x2a   : > { %s5319_s30 = scalar_select %p4477_p0, 1, 0 }
  0x2e   : > { %s3901_s29 = scalar_lea.hbm %s5320_s15, 1024 }
  0x2f   : > { %p3902_p1 = scmp.ne.s32.totalorder %s5320_s15, %s3901_s29  ;;  %p3908_p7 = scmp.lt.u32.totalorder %s3901_s29, %s5320_s15 }
  0x31   : > { %p3904_p3 = pnand %p3903_p2, %p3902_p1 }
  0x33   : > { %p3905_p6 = pneg %p3904_p3 }
  0x35   : > { %p3910_p4 = pnand %p3908_p7, %p3905_p6 }
  0x37   : > { %3913 = shalt.err (!%p3910_p4)
}
  0x38   : > { %s3914_s19 = scalar_lea.vmem %s510_s22, 1024  ;;  %p3922_p5 = scmp.lt.s32.totalorder %s510_s22, %s510_s22 }
  0x39   : > { %p3915_p11 = scmp.ne.s32.totalorder %s510_s22, %s3914_s19  ;;  %p3923_p8 = scmp.lt.s32.totalorder %s3914_s19, %s3914_s19 }
  0x3b   : > { %p3917_p13 = pnand %p3915_p11, %p3903_p2  ;;  %p3924_p10 = por %p3923_p8, %p3922_p5 }
  0x3d   : > { %p3918_p9 = pneg %p3917_p13 }
  0x3f   : > { %p3925_p0 = pnand %p3924_p10, %p3918_p9 }
  0x41   : > { %3928 = shalt.err (!%p3925_p0)
}
  0x42   : > { %s5288_s16 = smov 64   ;;  %s5290_s2 = smov 4  }
  0x43   : > { %3623 = dma.hbm_to_vmem [thread:$0]  (!%p4464_p12), %s5320_s15, 1024, %s510_s22, [#allocation18], %s5288_s16, %s5288_s16, %s5290_s2  }
  0x44   : > { %s3592_s29 = smul.u32 3, %s4470_s24  ;;  %s4503_s21 = sshll.u32 %s4287_s27, 4 }
  0x45   : > { %s3593_s18 = smul.u32 48, %s4287_s27  ;;  %s5321_s4 = sld [smem:[#allocation36_spill]] }
  0x46   : > { %s551_s23 = scalar_lea.vmem [#allocation5], %s3592_s29  ;;  %s4516_s26 = scalar_lea.hbm %s5264_s6, %s4503_s21 }
  0x47   : > { %s559_s28 = sshll.u32 %s551_s23, 4  ;;  %s5298_s16 = scalar_lea.sflag [#allocation6], %s4473_s0  ;;  %s4510_s28 = int_to_ptr.vmem [resolvable:$true] %s559_s28 }
  0x48   : > { %p5322_p8 = scmp.ne.s32.totalorder %s5319_s30, 0 }
  0x4a   : > { %p4523_p9 = pneg %p5322_p8 }
  0x4b   : > { %s4508_s11 = scalar_lea.hbm %s5321_s4, %s3593_s18  ;;  %s3934_s19 = scalar_lea.hbm %s5321_s4, 96 }
  0x4c   : > { %s3929_s2 = scalar_lea.hbm %s4508_s11, 48  ;;  %p3935_p0 = scmp.lt.u32.totalorder %s4508_s11, %s5321_s4 }
  0x4d   : > { %p3930_p5 = scmp.ne.s32.totalorder %s4508_s11, %s3929_s2  ;;  %p3936_p1 = scmp.lt.u32.totalorder %s3934_s19, %s3929_s2 }
  0x4e   : > { %p3938_p3 = scmp.lt.u32.totalorder %s3929_s2, %s4508_s11 }
  0x4f   : > { %p3932_p10 = pnand %p4523_p9, %p3930_p5  ;;  %p3937_p2 = por %p3936_p1, %p3935_p0 }
  0x51   : > { %p3933_p12 = pneg %p3932_p10  ;;  %p3939_p6 = por %p3938_p3, %p3937_p2 }
  0x53   : > { %p3940_p7 = pnand %p3939_p6, %p3933_p12 }
  0x55   : > { %3943 = shalt.err (!%p3940_p7)
}
  0x56   : > { %s3944_s22 = scalar_lea.vmem %s4510_s28, 48  ;;  %s4292_s29 = smov [#allocation5]  }
  0x57   : > { %p3945_p4 = scmp.ne.s32.totalorder %s4510_s28, %s3944_s22  ;;  %s3949_s18 = sshll.u32 %s4292_s29, 4  ;;  %s3950_s18 = int_to_ptr.vmem [resolvable:$false] %s3949_s18 }
  0x58   : > { %s3951_s23 = scalar_lea.vmem %s3950_s18, 96  ;;  %p3952_p5 = scmp.lt.s32.totalorder %s4510_s28, %s3950_s18 }
  0x59   : > { %p3947_p11 = pnand %p3945_p4, %p4523_p9  ;;  %p3953_p10 = scmp.lt.s32.totalorder %s3951_s23, %s3944_s22 }
  0x5b   : > { %p3948_p13 = pneg %p3947_p11  ;;  %p3954_p0 = por %p3953_p10, %p3952_p5 }
  0x5d   : > { %p3955_p1 = pnand %p3954_p0, %p3948_p13 }
  0x5f   : > { %3958 = shalt.err (!%p3955_p1)
}
  0x60   : > { %3630 = dma.hbm_to_vmem [thread:$0]  (!%p5322_p8), %s4508_s11, 48, %s4510_s28, %s5298_s16  }
  0x61   : > { %s590_s2 = scalar_lea.vmem [#allocation8], %s4470_s24  ;;  %s3194_s17 = sshll.u32 %s4470_s24, 1 }
  0x62   : > { %s597_s19 = sshll.u32 %s590_s2, 4  ;;  %s5296_s22 = scalar_lea.sflag [#allocation9], %s4473_s0  ;;  %s4549_s19 = int_to_ptr.vmem [resolvable:$true] %s597_s19 }
  0x63   : > { %s3959_s29 = scalar_lea.hbm %s4516_s26, 16  ;;  %s3964_s4 = scalar_lea.hbm %s5264_s6, 32 }
  0x64   : > { %p3960_p12 = scmp.ne.s32.totalorder %s4516_s26, %s3959_s29  ;;  %p3965_p6 = scmp.lt.u32.totalorder %s4516_s26, %s5264_s6 }
  0x65   : > { %p3966_p7 = scmp.lt.u32.totalorder %s3964_s4, %s3959_s29  ;;  %p3968_p11 = scmp.lt.u32.totalorder %s3959_s29, %s4516_s26 }
  0x66   : > { %p3962_p2 = pnand %p3960_p12, %p4523_p9 }
  0x67   : > { %p3967_p4 = por %p3966_p7, %p3965_p6 }
  0x68   : > { %p3963_p3 = pneg %p3962_p2 }
  0x69   : > { %p3969_p13 = por %p3968_p11, %p3967_p4 }
  0x6b   : > { %p3970_p5 = pnand %p3969_p13, %p3963_p3 }
  0x6d   : > { %3973 = shalt.err (!%p3970_p5)
}
  0x6e   : > { %s3974_s11 = scalar_lea.vmem %s4549_s19, 16  ;;  %s4293_s28 = smov [#allocation8]  }
  0x6f   : > { %p3975_p10 = scmp.ne.s32.totalorder %s4549_s19, %s3974_s11  ;;  %s3979_s2 = sshll.u32 %s4293_s28, 4  ;;  %s3980_s2 = int_to_ptr.vmem [resolvable:$false] %s3979_s2 }
  0x70   : > { %s3981_s15 = scalar_lea.vmem %s3980_s2, 32  ;;  %p3982_p12 = scmp.lt.s32.totalorder %s4549_s19, %s3980_s2 }
  0x71   : > { %p3977_p0 = pnand %p3975_p10, %p4523_p9  ;;  %p3983_p2 = scmp.lt.s32.totalorder %s3981_s15, %s3974_s11 }
  0x73   : > { %p3978_p1 = pneg %p3977_p0  ;;  %p3984_p6 = por %p3983_p2, %p3982_p12 }
  0x75   : > { %p3985_p7 = pnand %p3984_p6, %p3978_p1 }
  0x77   : > { %3988 = shalt.err (!%p3985_p7)
}
  0x78   : > { %3636 = dma.hbm_to_vmem [thread:$0]  (!%p5322_p8), %s4516_s26, 16, %s4549_s19, %s5296_s22  }
  0x79   : > { %s3322_s4 = sshll.u32 %s4287_s27, 5  ;;  %s629_s23 = scalar_lea.vmem [#allocation11], %s3194_s17 }
  0x7a   : > { %s4580_s18 = scalar_lea.hbm %s5266_s8, %s3322_s4  ;;  %s637_s11 = sshll.u32 %s629_s23, 4  ;;  %s638_s11 = int_to_ptr.vmem [resolvable:$true] %s637_s11 }
  0x7b   : > { %s5295_s28 = scalar_lea.sflag [#allocation12], %s4473_s0  ;;  %s3989_s2 = scalar_lea.hbm %s4580_s18, 32 }
  0x7c   : > { %p3990_p3 = scmp.ne.s32.totalorder %s4580_s18, %s3989_s2  ;;  %s3994_s15 = scalar_lea.hbm %s5266_s8, 64 }
  0x7d   : > { %p3995_p13 = scmp.lt.u32.totalorder %s4580_s18, %s5266_s8  ;;  %p3996_p5 = scmp.lt.u32.totalorder %s3994_s15, %s3989_s2 }
  0x7e   : > { %p3992_p4 = pnand %p3990_p3, %p4523_p9  ;;  %p3998_p0 = scmp.lt.u32.totalorder %s3989_s2, %s4580_s18 }
  0x7f   : > { %p3997_p10 = por %p3996_p5, %p3995_p13 }
  0x80   : > { %p3993_p11 = pneg %p3992_p4 }
  0x81   : > { %p3999_p1 = por %p3998_p0, %p3997_p10 }
  0x83   : > { %p4000_p12 = pnand %p3999_p1, %p3993_p11 }
  0x85   : > { %4003 = shalt.err (!%p4000_p12)
}
  0x86   : > { %s4004_s17 = scalar_lea.vmem %s638_s11, 32  ;;  %s4294_s29 = smov [#allocation11]  }
  0x87   : > { %p4005_p2 = scmp.ne.s32.totalorder %s638_s11, %s4004_s17  ;;  %s4009_s23 = sshll.u32 %s4294_s29, 4  ;;  %s4010_s23 = int_to_ptr.vmem [resolvable:$false] %s4009_s23 }
  0x88   : > { %s4011_s26 = scalar_lea.vmem %s4010_s23, 64  ;;  %p4012_p3 = scmp.lt.s32.totalorder %s638_s11, %s4010_s23 }
  0x89   : > { %p4007_p6 = pnand %p4005_p2, %p4523_p9  ;;  %p4013_p4 = scmp.lt.s32.totalorder %s4011_s26, %s4004_s17 }
  0x8b   : > { %p4008_p7 = pneg %p4007_p6  ;;  %p4014_p8 = por %p4013_p4, %p4012_p3 }
  0x8d   : > { %p4015_p5 = pnand %p4014_p8, %p4008_p7 }
  0x8f   : > { %4018 = shalt.err (!%p4015_p5)
}
  0x90   : > { %p5324_p13 = scmp.ne.s32.totalorder %s5319_s30, 0  ;;  %s4608_s15 = scalar_lea.hbm %s5268_s10, %s4503_s21 }
  0x91   : > { %s668_s4 = scalar_lea.vmem [#allocation14], %s4470_s24  ;;  %s3590_s17 = smul.u32 192, %s4470_s24 }
  0x92   : > { %3642 = dma.hbm_to_vmem [thread:$0]  (!%p5324_p13), %s4580_s18, 32, %s638_s11, %s5295_s28  }
  0x93   : > { %s675_s1 = sshll.u32 %s668_s4, 4  ;;  %s5297_s29 = scalar_lea.sflag [#allocation15], %s4473_s0  ;;  %s4611_s1 = int_to_ptr.vmem [resolvable:$true] %s675_s1 }
  0x94   : > { %s4019_s23 = scalar_lea.hbm %s4608_s15, 16  ;;  %s4024_s26 = scalar_lea.hbm %s5268_s10, 32 }
  0x95   : > { %p4020_p8 = scmp.ne.s32.totalorder %s4608_s15, %s4019_s23  ;;  %p4025_p0 = scmp.lt.u32.totalorder %s4608_s15, %s5268_s10 }
  0x96   : > { %p4026_p1 = scmp.lt.u32.totalorder %s4024_s26, %s4019_s23  ;;  %p4028_p2 = scmp.lt.u32.totalorder %s4019_s23, %s4608_s15 }
  0x97   : > { %p4022_p11 = pnand %p4020_p8, %p4523_p9 }
  0x98   : > { %p4027_p12 = por %p4026_p1, %p4025_p0 }
  0x99   : > { %p4023_p10 = pneg %p4022_p11 }
  0x9a   : > { %p4029_p6 = por %p4028_p2, %p4027_p12 }
  0x9c   : > { %p4030_p7 = pnand %p4029_p6, %p4023_p10 }
  0x9e   : > { %4033 = shalt.err (!%p4030_p7)
}
  0x9f   : > { %s4034_s4 = scalar_lea.vmem %s4611_s1, 16  ;;  %s4295_s18 = smov [#allocation14]  }
  0xa0   : > { %p4035_p3 = scmp.ne.s32.totalorder %s4611_s1, %s4034_s4  ;;  %s4039_s11 = sshll.u32 %s4295_s18, 4  ;;  %s4040_s11 = int_to_ptr.vmem [resolvable:$false] %s4039_s11 }
  0xa1   : > { %s4041_s2 = scalar_lea.vmem %s4040_s11, 32  ;;  %p4042_p8 = scmp.lt.s32.totalorder %s4611_s1, %s4040_s11 }
  0xa2   : > { %p4037_p4 = pnand %p4035_p3, %p4523_p9  ;;  %p4043_p11 = scmp.lt.s32.totalorder %s4041_s2, %s4034_s4 }
  0xa4   : > { %p4038_p5 = pneg %p4037_p4  ;;  %p4044_p0 = por %p4043_p11, %p4042_p8 }
  0xa6   : > { %p4045_p1 = pnand %p4044_p0, %p4038_p5 }
  0xa8   : > { %4048 = shalt.err (!%p4045_p1)
}
  0xa9   : > { %3648 = dma.hbm_to_vmem [thread:$0]  (!%p5324_p13), %s4608_s15, 16, %s4611_s1, %s5297_s29  }
  0xaa   : > { %s3591_s23 = smul.u32 3072, %s4287_s27  ;;  %s530_s26 = scalar_lea.vmem [#allocation3], %s3590_s17 }
  0xab   : > { %s537_s19 = sshll.u32 %s530_s26, 4  ;;  %s5325_s3 = sld [smem:[#allocation35_spill]]  ;;  %s4646_s19 = int_to_ptr.vmem [resolvable:$true] %s537_s19 }
  0xac   : > { %s3187_s2 = sshll.u32 %s4470_s24, 6  ;;  %s527_s28 = scalar_lea.sflag [#allocation4], %s4470_s24 }
  0xb1   : > { %s4644_s11 = scalar_lea.hbm %s5325_s3, %s3591_s23  ;;  %s4054_s17 = scalar_lea.hbm %s5325_s3, 6144 }
  0xb2   : > { %s4049_s22 = scalar_lea.hbm %s4644_s11, 3072  ;;  %p4055_p6 = scmp.lt.u32.totalorder %s4644_s11, %s5325_s3 }
  0xb3   : > { %p4050_p10 = scmp.ne.s32.totalorder %s4644_s11, %s4049_s22  ;;  %p4056_p7 = scmp.lt.u32.totalorder %s4054_s17, %s4049_s22 }
  0xb4   : > { %p4058_p4 = scmp.lt.u32.totalorder %s4049_s22, %s4644_s11 }
  0xb5   : > { %p4052_p12 = pnand %p4050_p10, %p4523_p9  ;;  %p4057_p3 = por %p4056_p7, %p4055_p6 }
  0xb7   : > { %p4053_p2 = pneg %p4052_p12  ;;  %p4059_p5 = por %p4058_p4, %p4057_p3 }
  0xb9   : > { %p4060_p8 = pnand %p4059_p5, %p4053_p2 }
  0xbb   : > { %4063 = shalt.err (!%p4060_p8)
}
  0xbc   : > { %s4064_s4 = scalar_lea.vmem %s4646_s19, 3072  ;;  %s4296_s18 = smov [#allocation3]  }
  0xbd   : > { %p4065_p11 = scmp.ne.s32.totalorder %s4646_s19, %s4064_s4  ;;  %s4069_s15 = sshll.u32 %s4296_s18, 4  ;;  %s4070_s15 = int_to_ptr.vmem [resolvable:$false] %s4069_s15 }
  0xbe   : > { %s4071_s1 = scalar_lea.vmem %s4070_s15, 6144  ;;  %p4072_p10 = scmp.lt.s32.totalorder %s4646_s19, %s4070_s15 }
  0xbf   : > { %p4067_p0 = pnand %p4065_p11, %p4523_p9  ;;  %p4073_p12 = scmp.lt.s32.totalorder %s4071_s1, %s4064_s4 }
  0xc1   : > { %p4068_p1 = pneg %p4067_p0  ;;  %p4074_p6 = por %p4073_p12, %p4072_p10 }
  0xc3   : > { %p4075_p7 = pnand %p4074_p6, %p4068_p1 }
  0xc5   : > { %4078 = shalt.err (!%p4075_p7)
}
  0xc6   : > { %s4297_s22 = smov 192   ;;  %s4298_s17 = smov 12  }
  0xc7   : > { %3627 = dma.hbm_to_vmem [thread:$0]  (!%p5324_p13), %s4644_s11, 3072, %s4646_s19, %s527_s28, %s4297_s22, %s4297_s22, %s4298_s17  }
  0xc8   : > { %s3320_s26 = sshll.u32 %s4287_s27, 10  ;;  %s570_s15 = scalar_lea.vmem [#allocation7], %s3187_s2 }
  0xc9   : > { %s4677_s4 = scalar_lea.hbm %s5263_s5, %s3320_s26  ;;  %s577_s1 = sshll.u32 %s570_s15, 4  ;;  %s4681_s1 = int_to_ptr.vmem [resolvable:$true] %s577_s1 }
  0xca   : > { %s3191_s29 = sshll.u32 %s4470_s24, 7  ;;  %s4079_s16 = scalar_lea.hbm %s4677_s4, 1024 }
  0xcb   : > { %p4080_p2 = scmp.ne.s32.totalorder %s4677_s4, %s4079_s16  ;;  %s4084_s11 = scalar_lea.hbm %s5263_s5, 2048 }
  0xcc   : > { %p4085_p5 = scmp.lt.u32.totalorder %s4677_s4, %s5263_s5  ;;  %p4086_p8 = scmp.lt.u32.totalorder %s4084_s11, %s4079_s16 }
  0xcd   : > { %p4082_p3 = pnand %p4080_p2, %p4523_p9  ;;  %p4088_p0 = scmp.lt.u32.totalorder %s4079_s16, %s4677_s4 }
  0xce   : > { %p4087_p11 = por %p4086_p8, %p4085_p5 }
  0xcf   : > { %p4083_p4 = pneg %p4082_p3 }
  0xd0   : > { %p4089_p1 = por %p4088_p0, %p4087_p11 }
  0xd2   : > { %p4090_p10 = pnand %p4089_p1, %p4083_p4 }
  0xd4   : > { %4093 = shalt.err (!%p4090_p10)
}
  0xd5   : > { %s4094_s2 = scalar_lea.vmem %s4681_s1, 1024  ;;  %s4299_s26 = smov [#allocation7]  }
  0xd6   : > { %p4095_p12 = scmp.ne.s32.totalorder %s4681_s1, %s4094_s2  ;;  %s4099_s23 = sshll.u32 %s4299_s26, 4  ;;  %s4100_s23 = int_to_ptr.vmem [resolvable:$false] %s4099_s23 }
  0xd7   : > { %s4101_s18 = scalar_lea.vmem %s4100_s23, 2048  ;;  %p4102_p2 = scmp.lt.s32.totalorder %s4681_s1, %s4100_s23 }
  0xd8   : > { %p4097_p6 = pnand %p4095_p12, %p4523_p9  ;;  %p4103_p3 = scmp.lt.s32.totalorder %s4101_s18, %s4094_s2 }
  0xda   : > { %p4098_p7 = pneg %p4097_p6  ;;  %p4104_p5 = por %p4103_p3, %p4102_p2 }
  0xdc   : > { %p4105_p8 = pnand %p4104_p5, %p4098_p7 }
  0xde   : > { %4108 = shalt.err (!%p4105_p8)
}
  0xdf   : > { %s5326_s16 = smov 4   ;;  %s5327_s15 = smov 64  }
  0xe0   : > { %s5328_s28 = scalar_lea.sflag [#allocation6], %s4473_s0  ;;  %s3321_s19 = sshll.u32 %s4287_s27, 11 }
  0xe1   : > { %3633 = dma.hbm_to_vmem [thread:$0]  (!%p5324_p13), %s4677_s4, 1024, %s4681_s1, %s5328_s28, %s5327_s15, %s5327_s15, %s5326_s16  }
  0xe2   : > { %s4716_s17 = scalar_lea.hbm %s5265_s7, %s3321_s19  ;;  %s608_s2 = scalar_lea.vmem [#allocation10], %s3191_s29 }
  0xe3   : > { %s615_s26 = sshll.u32 %s608_s2, 4  ;;  %s4109_s23 = scalar_lea.hbm %s4716_s17, 2048  ;;  %s4720_s26 = int_to_ptr.vmem [resolvable:$true] %s615_s26 }
  0xe4   : > { %p4110_p4 = scmp.ne.s32.totalorder %s4716_s17, %s4109_s23  ;;  %s4114_s18 = scalar_lea.hbm %s5265_s7, 4096 }
  0xe5   : > { %p4115_p1 = scmp.lt.u32.totalorder %s4716_s17, %s5265_s7  ;;  %p4116_p10 = scmp.lt.u32.totalorder %s4114_s18, %s4109_s23 }
  0xe6   : > { %p4112_p11 = pnand %p4110_p4, %p4523_p9  ;;  %p4118_p6 = scmp.lt.u32.totalorder %s4109_s23, %s4716_s17 }
  0xe7   : > { %p4117_p12 = por %p4116_p10, %p4115_p1 }
  0xe8   : > { %p4113_p0 = pneg %p4112_p11 }
  0xe9   : > { %p4119_p7 = por %p4118_p6, %p4117_p12 }
  0xeb   : > { %p4120_p2 = pnand %p4119_p7, %p4113_p0 }
  0xed   : > { %4123 = shalt.err (!%p4120_p2)
}
  0xee   : > { %s4124_s22 = scalar_lea.vmem %s4720_s26, 2048  ;;  %s4300_s2 = smov [#allocation10]  }
  0xef   : > { %p4125_p3 = scmp.ne.s32.totalorder %s4720_s26, %s4124_s22  ;;  %s4129_s4 = sshll.u32 %s4300_s2, 4  ;;  %s4130_s4 = int_to_ptr.vmem [resolvable:$false] %s4129_s4 }
  0xf0   : > { %s4131_s1 = scalar_lea.vmem %s4130_s4, 4096  ;;  %p4132_p4 = scmp.lt.s32.totalorder %s4720_s26, %s4130_s4 }
  0xf1   : > { %p4127_p5 = pnand %p4125_p3, %p4523_p9  ;;  %p4133_p11 = scmp.lt.s32.totalorder %s4131_s1, %s4124_s22 }
  0xf3   : > { %p4128_p8 = pneg %p4127_p5  ;;  %p4134_p1 = por %p4133_p11, %p4132_p4 }
  0xf5   : > { %p4135_p10 = pnand %p4134_p1, %p4128_p8 }
  0xf7   : > { %4138 = shalt.err (!%p4135_p10)
}
  0xf8   : > { %s4301_s23 = smov 128   ;;  %s4302_s18 = smov 8  }
  0xf9   : > { %s5329_s28 = scalar_lea.sflag [#allocation9], %s4473_s0  ;;  %s4750_s22 = scalar_lea.hbm %s5267_s9, %s3321_s19 }
  0xfa   : > { %3639 = dma.hbm_to_vmem [thread:$0]  (!%p5324_p13), %s4716_s17, 2048, %s4720_s26, %s5329_s28, %s4301_s23, %s4301_s23, %s4302_s18  }
  0xfb   : > { %s648_s4 = scalar_lea.vmem [#allocation13], %s3191_s29  ;;  %s4139_s3 = scalar_lea.hbm %s4750_s22, 2048 }
  0xfc   : > { %s655_s1 = sshll.u32 %s648_s4, 4  ;;  %p4140_p0 = scmp.ne.s32.totalorder %s4750_s22, %s4139_s3  ;;  %s4754_s1 = int_to_ptr.vmem [resolvable:$true] %s655_s1 }
  0xfd   : > { %s4144_s26 = scalar_lea.hbm %s5267_s9, 4096  ;;  %p4145_p7 = scmp.lt.u32.totalorder %s4750_s22, %s5267_s9 }
  0xfe   : > { %p4142_p12 = pnand %p4140_p0, %p4523_p9  ;;  %p4146_p2 = scmp.lt.u32.totalorder %s4144_s26, %s4139_s3 }
  0xff   : > { %p4148_p5 = scmp.lt.u32.totalorder %s4139_s3, %s4750_s22 }
 0x100   : > { %p4143_p6 = pneg %p4142_p12  ;;  %p4147_p3 = por %p4146_p2, %p4145_p7 }
 0x102   : > { %p4149_p8 = por %p4148_p5, %p4147_p3 }
 0x104   : > { %p4150_p4 = pnand %p4149_p8, %p4143_p6 }
 0x106   : > { %4153 = shalt.err (!%p4150_p4)
}
 0x107   : > { %s4154_s29 = scalar_lea.vmem %s4754_s1, 2048  ;;  %s4303_s18 = smov [#allocation13]  }
 0x108   : > { %p4155_p11 = scmp.ne.s32.totalorder %s4754_s1, %s4154_s29  ;;  %s4159_s28 = sshll.u32 %s4303_s18, 4  ;;  %s4160_s28 = int_to_ptr.vmem [resolvable:$false] %s4159_s28 }
 0x109   : > { %s4161_s11 = scalar_lea.vmem %s4160_s28, 4096  ;;  %p4162_p0 = scmp.lt.s32.totalorder %s4754_s1, %s4160_s28 }
 0x10a   : > { %p4157_p1 = pnand %p4155_p11, %p4523_p9  ;;  %p4163_p12 = scmp.lt.s32.totalorder %s4161_s11, %s4154_s29 }
 0x10c   : > { %p4158_p10 = pneg %p4157_p1  ;;  %p4164_p7 = por %p4163_p12, %p4162_p0 }
 0x10e   : > { %p4165_p2 = pnand %p4164_p7, %p4158_p10 }
 0x110   : > { %4168 = shalt.err (!%p4165_p2)
}
 0x111   : > { %s5330_s3 = scalar_lea.sflag [#allocation12], %s4473_s0  ;;  %s4786_s27 = scalar_lea.hbm %s5270_s12, %s4503_s21 }
 0x112   : > { %3645 = dma.hbm_to_vmem [thread:$0]  (!%p5324_p13), %s4750_s22, 2048, %s4754_s1, %s5330_s3, %s5327_s15, %s5327_s15, %s5326_s16  }
 0x113   : > { %s691_s17 = scalar_lea.vmem [#allocation16], %s4470_s24  ;;  %s4169_s19 = scalar_lea.hbm %s4786_s27, 16 }
 0x114   : > { %s698_s26 = sshll.u32 %s691_s17, 4  ;;  %p4170_p6 = scmp.ne.s32.totalorder %s4786_s27, %s4169_s19  ;;  %s699_s26 = int_to_ptr.vmem [resolvable:$true] %s698_s26 }
 0x115   : > { %s4174_s16 = scalar_lea.hbm %s5270_s12, 32  ;;  %p4175_p8 = scmp.lt.u32.totalorder %s4786_s27, %s5270_s12 }
 0x116   : > { %p4172_p3 = pnand %p4170_p6, %p4523_p9  ;;  %p4176_p4 = scmp.lt.u32.totalorder %s4174_s16, %s4169_s19 }
 0x117   : > { %p4178_p1 = scmp.lt.u32.totalorder %s4169_s19, %s4786_s27 }
 0x118   : > { %p4173_p5 = pneg %p4172_p3  ;;  %p4177_p11 = por %p4176_p4, %p4175_p8 }
 0x11a   : > { %p4179_p10 = por %p4178_p1, %p4177_p11 }
 0x11c   : > { %p4180_p0 = pnand %p4179_p10, %p4173_p5 }
 0x11e   : > { %4183 = shalt.err (!%p4180_p0)
}
 0x11f   : > { %s4184_s1 = scalar_lea.vmem %s699_s26, 16  ;;  %s4304_s18 = smov [#allocation16]  }
 0x120   : > { %p4185_p12 = scmp.ne.s32.totalorder %s699_s26, %s4184_s1  ;;  %s4189_s28 = sshll.u32 %s4304_s18, 4  ;;  %s4190_s28 = int_to_ptr.vmem [resolvable:$false] %s4189_s28 }
 0x121   : > { %s4191_s11 = scalar_lea.vmem %s4190_s28, 32  ;;  %p4192_p6 = scmp.lt.s32.totalorder %s699_s26, %s4190_s28 }
 0x122   : > { %p4187_p7 = pnand %p4185_p12, %p4523_p9  ;;  %p4193_p3 = scmp.lt.s32.totalorder %s4191_s11, %s4184_s1 }
 0x124   : > { %p4188_p2 = pneg %p4187_p7  ;;  %p4194_p13 = por %p4193_p3, %p4192_p6 }
 0x126   : > { %p4195_p4 = pnand %p4194_p13, %p4188_p2 }
 0x128   : > { %4198 = shalt.err (!%p4195_p4)
}
 0x129   : > { %p5331_p8 = scmp.ne.s32.totalorder %s5319_s30, 0  ;;  %s5332_s3 = scalar_lea.sflag [#allocation15], %s4473_s0 }
 0x12a   : > { %s4812_s17 = scalar_lea.hbm %s5272_s14, %s4503_s21  ;;  %s714_s19 = scalar_lea.vmem [#allocation17], %s4470_s24 }
 0x12b   : > { %3651 = dma.hbm_to_vmem [thread:$0]  (!%p5331_p8), %s4786_s27, 16, %s699_s26, %s5332_s3  }
 0x12c   : > { %s721_s23 = sshll.u32 %s714_s19, 4  ;;  %s712_s29 = scalar_lea.sflag [#allocation18], %s4473_s0  ;;  %s722_s23 = int_to_ptr.vmem [resolvable:$true] %s721_s23 }
 0x12d   : > { %s4199_s16 = scalar_lea.hbm %s4812_s17, 16  ;;  %s4204_s26 = scalar_lea.hbm %s5272_s14, 32 }
 0x12e   : > { %p4200_p13 = scmp.ne.s32.totalorder %s4812_s17, %s4199_s16  ;;  %p4205_p1 = scmp.lt.u32.totalorder %s4812_s17, %s5272_s14 }
 0x12f   : > { %p4206_p10 = scmp.lt.u32.totalorder %s4204_s26, %s4199_s16  ;;  %p4208_p12 = scmp.lt.u32.totalorder %s4199_s16, %s4812_s17 }
 0x130   : > { %p4202_p5 = pnand %p4200_p13, %p4523_p9 }
 0x131   : > { %p4207_p0 = por %p4206_p10, %p4205_p1 }
 0x132   : > { %p4203_p11 = pneg %p4202_p5 }
 0x133   : > { %p4209_p7 = por %p4208_p12, %p4207_p0 }
 0x135   : > { %p4210_p2 = pnand %p4209_p7, %p4203_p11 }
 0x137   : > { %4213 = shalt.err (!%p4210_p2)
}
 0x138   : > { %s4214_s24 = scalar_lea.vmem %s722_s23, 16  ;;  %s4305_s0 = smov [#allocation17]  }
 0x139   : > { %p4215_p6 = scmp.ne.s32.totalorder %s722_s23, %s4214_s24  ;;  %s4219_s1 = sshll.u32 %s4305_s0, 4  ;;  %s4220_s1 = int_to_ptr.vmem [resolvable:$false] %s4219_s1 }
 0x13a   : > { %s4221_s18 = scalar_lea.vmem %s4220_s1, 32  ;;  %p4222_p13 = scmp.lt.s32.totalorder %s722_s23, %s4220_s1 }
 0x13b   : > { %p4217_p3 = pnand %p4215_p6, %p4523_p9  ;;  %p4223_p5 = scmp.lt.s32.totalorder %s4221_s18, %s4214_s24 }
 0x13d   : > { %p4218_p4 = pneg %p4217_p3  ;;  %p4224_p8 = por %p4223_p5, %p4222_p13 }
 0x13f   : > { %p4225_p1 = pnand %p4224_p8, %p4218_p4 }
 0x141   : > { %4228 = shalt.err (!%p4225_p1)
}
 0x142   : > { %p5333_p10 = scmp.ne.s32.totalorder %s5319_s30, 0  ;;  %p5334_p11 = scmp.ne.s32.totalorder %s5317_s20, 0 }
 0x143   : > { %s5335_s13 = sld [smem:[#allocation31_spill]] (!%p5334_p11)  ;;  %s4836_s28 = sand.u32 (!%p5334_p11), 1, %s4279_s25  }
 0x144   : > { %3654 = dma.hbm_to_vmem [thread:$0]  (!%p5333_p10), %s4812_s17, 16, %s722_s23, %s712_s29  }
 0x145   : > { %730 = sbr.rel (%p5334_p11) target bundleno = 3244 (0xcac), region = 88  ;;  %s733_s3 = scalar_lea.sflag (!%p5334_p11), [#allocation4], %s4836_s28 }
 0x146   : > { %s3594_s11 = smul.u32 (!%p5334_p11), 192, %s4836_s28 }
 0x148   : > { %s4840_s2 = scalar_lea.vmem (!%p5334_p11), [#allocation3], %s3594_s11 }
 0x149   : > { %p5336_p9 = scmp.ne.s32.totalorder (!%p5334_p11), %s5335_s13, 0 }
 0x14c   : > { %4246 = dma.done.wait (%p5336_p9), %s733_s3, 3072  }
 0x14d   : > { %4248 = vsyncadd (%p5336_p9), %s733_s3, 4294964224  ;;  %s5337_s30 = sld [smem:[#allocation28_spill]]  ;;  %s3595_s4 = smul.u32 3, %s4836_s28 }
 0x14f   : > { %s4848_s19 = scalar_lea.vmem [#allocation5], %s3595_s4 }
 0x153   : > { %s741_s20 = sand.u32 1, %s5337_s30  }
 0x154   : > { %s742_s17 = scalar_lea.sflag [#allocation6], %s741_s20 }
 0x155   : > { %4250 = dma.done.wait (%p5336_p9), %s742_s17, 1072  }
 0x156   : > { %4252 = vsyncadd (%p5336_p9), %s742_s17, 4294966224  ;;  %s3204_s23 = sshll.u32 %s4836_s28, 6  ;;  %s760_s16 = scalar_lea.sflag [#allocation9], %s741_s20 }
 0x157   : > { %s4855_s29 = scalar_lea.vmem [#allocation7], %s3204_s23 }
 0x158   : > { %4254 = dma.done.wait (%p5336_p9), %s760_s16, 2064  }
 0x159   : > { %4256 = vsyncadd (%p5336_p9), %s760_s16, 4294965232  ;;  %s3205_s27 = sshll.u32 %s4836_s28, 7  ;;  %s3206_s26 = sshll.u32 %s4836_s28, 1 }
 0x15a   : > { %s4864_s22 = scalar_lea.vmem [#allocation10], %s3205_s27  ;;  %s777_s21 = scalar_lea.sflag [#allocation12], %s741_s20 }
 0x15b   : > { %s4866_s24 = scalar_lea.vmem [#allocation11], %s3206_s26 }
 0x15c   : > { %4258 = dma.done.wait (%p5336_p9), %s777_s21, 2080  }
 0x15d   : > { %4260 = vsyncadd (%p5336_p9), %s777_s21, 4294965216  ;;  %s4872_s0 = scalar_lea.vmem [#allocation13], %s3205_s27  ;;  %s795_s1 = scalar_lea.sflag [#allocation15], %s741_s20 }
 0x15e   : > { %4262 = dma.done.wait (%p5336_p9), %s795_s1, 32  }
 0x15f   : > { %4264 = vsyncadd (%p5336_p9), %s795_s1, 4294967264  ;;  %s811_s3 = scalar_lea.sflag [#allocation18], %s741_s20 }
 0x160   : > { %4266 = dma.done.wait (%p5336_p9), %s811_s3, 16  }
 0x161   : > { %4268 = vsyncadd (%p5336_p9), %s811_s3, 4294967280  ;;  %p5338_p8 = scmp.eq.s32.totalorder %s5337_s30, 0 }
 0x163   : > { %4270 = dma.done.wait (%p5338_p8), [#allocation18], 1024   ;;  %p5339_p0 = pmov %p5338_p8 }
 0x164   : > { %p910_p12 = scmp.lt.s32.totalorder %s5337_s30, 1  ;;  %s5340_s16 = sld [smem:[#allocation37_spill]] }
 0x165   : > { %4272 = vsyncadd (%p5339_p0), [#allocation18], 4294966272  ;;  %s5341_s21 = sld [smem:[#allocation38_spill]]  ;;  %p5342_p7 = scmp.ne.s32.totalorder %s5337_s30, 0 }
 0x166   : > { %s4891_s17 = scalar_select %p910_p12, %s5337_s30, 1 }
 0x167   : > { %920 = sbr.rel (%p5342_p7) target bundleno = 717 (0x2cd), region = 136  ;;  %s5343_s18 = sld [smem:[#allocation32_spill]] (!%p5342_p7)  ;;  %v4306_v1 = vmov (!%p5342_p7), 0   ;;  %v4307_v2 = vmov (!%p5342_p7), 0.0   ;;  %vm4308_vm0 = vmmov (!%p5342_p7), 0   ;;  %v923_v12 = vlaneseq (!%p5342_p7) }
 0x168   : > { %3709 = vset.pattern.permute.xlu0 (!%p5342_p7), %v4306_v1  ;;  %3414 = vmatprep.subr.bf16.mxu0 (!%p5342_p7), %v4307_v2  ;;  %s5344_s23 = sld [smem:[#allocation34_spill]] (!%p5342_p7)  ;;  %v4309_v16 = vmov (!%p5342_p7), 1.0|1.0  }
 0x169   : > { %3430 = vmatprep.mubr.msk.bf16.mxu0 (!%p5342_p7), %vm4308_vm0, %v4307_v2  ;;  %v924_v14 = vand.u32 (!%p5342_p7), 127, %v923_v12 }
 0x16a   : > { %s912_s27 = scalar_lea.vmem %s5340_s16, %s4891_s17 }
 0x16b   : > { %s915_s1 = scalar_lea.vmem %s5341_s21, %s4891_s17  ;;  %s5345_s21 = sld [smem:[#allocation33_spill]] (!%p5342_p7) }
 0x16d   : > { %v921_v0 = vld [vmem:[%s5343_s18] sm:$0xff] (!%p5342_p7)  ;;  %v922_v4 = vld [vmem:[%s5343_s18 + $0x8] sm:$0xff] (!%p5342_p7) }
 0x16e   : > { %v3710_v3 = vld [vmem:[%s5344_s23] sm:$0xff]   ;;  %926 = vperm.xlu0 %3709, %v921_v0   ;;  %v3711_v5 = vld [vmem:[%s5344_s23 + $0x8] sm:$0xff]   ;;  %v3712_v6 = vld [vmem:[%s5344_s23 + $0x10] sm:$0xff]  }
 0x16f   : > { %3415 = vmatpush3.bf16.msra.mxu0 %v3710_v3  ;;  %v3713_v7 = vld [vmem:[%s5344_s23 + $0x18] sm:$0xff]   ;;  %v3714_v8 = vld [vmem:[%s5344_s23 + $0x20] sm:$0xff]   ;;  %v3715_v9 = vld [vmem:[%s5344_s23 + $0x28] sm:$0xff]  }
 0x170   : > { %3416 = vmatprep.subr.bf16.mxu0 %v4307_v2  ;;  %v3716_v10 = vld [vmem:[%s5344_s23 + $0x30] sm:$0xff]   ;;  %v3717_v11 = vld [vmem:[%s5344_s23 + $0x38] sm:$0xff]  }
 0x171   : > { %v1043_v17 = vld [vmem:[%s5345_s21] sm:$0xff] }
 0x172   : > { %929 = vperm.xlu0 %3709, %v922_v4  }
 0x173   : > { %3417 = vmatpush3.bf16.msra.mxu0 %v3711_v5 }
 0x174   : > { %3418 = vmatprep.subr.bf16.mxu0 %v4307_v2 }
 0x177   : > { %3419 = vmatpush3.bf16.msra.mxu0 %v3712_v6 }
 0x178   : > { %3420 = vmatprep.subr.bf16.mxu0 %v4307_v2 }
 0x17b   : > { %3421 = vmatpush3.bf16.msra.mxu0 %v3713_v7 }
 0x17c   : > { %3422 = vmatprep.subr.bf16.mxu0 %v4307_v2 }
 0x17f   : > { %3423 = vmatpush3.bf16.msra.mxu0 %v3714_v8 }
 0x180   : > { %3424 = vmatprep.subr.bf16.mxu0 %v4307_v2 }
 0x183   : > { %3425 = vmatpush3.bf16.msra.mxu0 %v3715_v9 }
 0x184   : > { %3426 = vmatprep.subr.bf16.mxu0 %v4307_v2 }
 0x187   : > { %3427 = vmatpush3.bf16.msra.mxu0 %v3716_v10 }
 0x188   : > { %3428 = vmatprep.subr.bf16.mxu0 %v4307_v2 }
 0x18b   : > { %3429 = vmatpush3.bf16.msra.mxu0 %v3717_v11 }
 0x1ed   : > { %v927_v13 = vpop.permute.xlu0 %926 }
 0x1ee   : > { %vm931_vm1 = vcmp.eq.s32.totalorder %v924_v14, %v927_v13 }
 0x1f1   : > { %v930_v15 = vpop.permute.xlu0 %929 }
 0x1f2   : > { %vm932_vm2 = vcmp.eq.s32.totalorder %v924_v14, %v930_v15 }
 0x1f3   : > { %vm3220_vm3 = vmpackc.low %vm932_vm2, %vm931_vm1 }
 0x1f4   : > { %3431 = vmatmul.mubr.msk.bf16.vlgmr.msra.gmra.mrb[0].mxu0 %vm3220_vm3, %v4309_v16 }
 0x2c7   : > { %v1036_v18 = vpop.f32.mrb[0].mxu0 }
 0x2c8   : > { %v1044_v19 = vadd.f32 %v1043_v17, %v1036_v18  ;;  %v3432_v20 = vpop.f32.mrb[1].mxu0 }
 0x2c9   : > { %v1039_v21 = vpop.f32.mrb[2].mxu0 }
 0x2ca   : > { %1046 = vst [vmem:[#allocation2] sm:$0xff] %v1044_v19  ;;  %v1045_v22 = vadd.f32 %v1043_v17, %v1039_v21  ;;  %v3433_v23 = vpop.f32.mrb[3].mxu0 }
 0x2cc   : > { %1047 = vst [vmem:[#allocation2 + $0x8] sm:$0xff] %v1045_v22 }
 0x2cd PF: > { %v3773_v24 = vld [vmem:[%s4840_s2 + $0x4] ss:$12 sps:$4 sm:$0xff]   ;;  %v3775_v25 = vld [vmem:[%s4840_s2] ss:$12 sps:$4 sm:$0xff]   ;;  %v4310_v26 = vmov 0   ;;  %v4311_v27 = vmov 0.0   ;;  %v1149_v53 = vlaneseq }
 0x2ce   : > { %1324 = vmatprep.mubr.bf16.mxu0 %v4310_v26  ;;  %3434 = vmatprep.subr.bf16.mxu1 %v4311_v27  ;;  %v3776_v28 = vld [vmem:[%s4840_s2 + $0x1c] ss:$12 sps:$4 sm:$0xff]   ;;  %v3778_v29 = vld [vmem:[%s4840_s2 + $0x18] ss:$12 sps:$4 sm:$0xff]   ;;  %v3779_v30 = vld [vmem:[%s4840_s2 + $0x34] ss:$12 sps:$4 sm:$0xff]  }
 0x2cf   : > { %1292 = vmatprep.subr.bf16.mxu0 %v3773_v24  ;;  %v3781_v31 = vld [vmem:[%s4840_s2 + $0x30] ss:$12 sps:$4 sm:$0xff]   ;;  %v3782_v32 = vld [vmem:[%s4840_s2 + $0x4c] ss:$12 sps:$4 sm:$0xff]   ;;  %v3784_v33 = vld [vmem:[%s4840_s2 + $0x48] ss:$12 sps:$4 sm:$0xff]  }
 0x2d0   : > { %1293 = vmatpush1.bf16.msra.mxu0 %v3775_v25  ;;  %v3785_v34 = vld [vmem:[%s4840_s2 + $0x64] ss:$12 sps:$4 sm:$0xff]   ;;  %v3797_v35 = vld [vmem:[%s4840_s2 + $0x8] ss:$12 sps:$4 sm:$0xff]   ;;  %v3798_v36 = vld [vmem:[%s4840_s2 + $0x20] ss:$12 sps:$4 sm:$0xff]  }
 0x2d1   : > { %1294 = vmatprep.subr.bf16.mxu0 %v3776_v28  ;;  %3435 = vmatpush3.bf16.msra.mxu1 %v3797_v35  ;;  %v3787_v37 = vld [vmem:[%s4840_s2 + $0x60] ss:$12 sps:$4 sm:$0xff]   ;;  %v3788_v38 = vld [vmem:[%s4840_s2 + $0x7c] ss:$12 sps:$4 sm:$0xff]   ;;  %v3799_v39 = vld [vmem:[%s4840_s2 + $0x38] ss:$12 sps:$4 sm:$0xff]  }
 0x2d2   : > { %3436 = vmatprep.subr.bf16.mxu1 %v4311_v27  ;;  %v3790_v40 = vld [vmem:[%s4840_s2 + $0x78] ss:$12 sps:$4 sm:$0xff]   ;;  %v3791_v41 = vld [vmem:[%s4840_s2 + $0x94] ss:$12 sps:$4 sm:$0xff]   ;;  %v3800_v42 = vld [vmem:[%s4840_s2 + $0x50] ss:$12 sps:$4 sm:$0xff]  }
 0x2d3   : > { %v3793_v43 = vld [vmem:[%s4840_s2 + $0x90] ss:$12 sps:$4 sm:$0xff]   ;;  %v3794_v44 = vld [vmem:[%s4840_s2 + $0xac] ss:$12 sps:$4 sm:$0xff]   ;;  %v3801_v45 = vld [vmem:[%s4840_s2 + $0x68] ss:$12 sps:$4 sm:$0xff]  }
 0x2d4   : > { %1295 = vmatpush1.bf16.msra.mxu0 %v3778_v29  ;;  %v3796_v46 = vld [vmem:[%s4840_s2 + $0xa8] ss:$12 sps:$4 sm:$0xff]   ;;  %v4964_v48 = vld [vmem:[#allocation2 + $0x8] sm:$0xff]  ;;  %v3802_v49 = vld [vmem:[%s4840_s2 + $0x80] ss:$12 sps:$4 sm:$0xff]   ;;  %vm4312_vm4 = vmmov 0  }
 0x2d5   : > { %1296 = vmatprep.subr.bf16.mxu0 %v3779_v30  ;;  %3437 = vmatpush3.bf16.msra.mxu1 %v3798_v36  ;;  %v4962_v47 = vld [vmem:[#allocation2] sm:$0xff]  ;;  %v3803_v51 = vld [vmem:[%s4840_s2 + $0x98] ss:$12 sps:$4 sm:$0xff]   ;;  %v4983_v54 = vshrl.u32 %v1149_v53, 7  ;;  %vm1460_vm5 = vcmask 261120   ;;  %s4315_s3 = smov 32  }
 0x2d6   : > { %3438 = vmatprep.subr.bf16.mxu1 %v4311_v27  ;;  %v1146_v50 = vpack.c.bf16 %v4964_v48, %v4962_v47  ;;  %v3804_v52 = vld [vmem:[%s4840_s2 + $0xb0] ss:$12 sps:$4 sm:$0xff]   ;;  %3450 = vmatprep.mubr.msk.bf16.mxu1 %vm4312_vm4, %v4311_v27  ;;  %v4987_v56 = vld [vmem:[%s4848_s19] sm:$0x7]  ;;  %s4313_s2 = smov 96   ;;  %s4314_s19 = smov 64  }
 0x2d7   : > { %v1155_v55 = vsub.s32 1, %v4983_v54  ;;  %v1151_v57 = vsub.s32 0, %v4983_v54  ;;  %v1159_v30 = vsub.s32 2, %v4983_v54  ;;  %vm1937_vm6 = vcmask 1043456   ;;  %s5348_s30 = scalar_lea.vmem [#allocation16], %s4836_s28  ;;  %s5351_s4 = scalar_lea.vmem [#allocation17], %s4836_s28 }
 0x2d8   : > { %1297 = vmatpush1.bf16.msra.mxu0 %v3781_v31  ;;  %vm1837_vm7 = vcmask 64512   ;;  %vm2329_vm8 = vcmask 523264   ;;  %vm2332_vm9 = vcmask 785408   ;;  %s5352_s13 = sld [smem:[#allocation28_spill]] }
 0x2d9   : > { %1298 = vmatprep.subr.bf16.mxu0 %v3782_v32  ;;  %3439 = vmatpush3.bf16.msra.mxu1 %v3799_v39  ;;  %v1156_v58 = vrot.slane %v4987_v56, %v1155_v55  ;;  %v1152_v59 = vrot.slane %v4987_v56, %v1151_v57  ;;  %v1160_v39 = vrot.slane %v4987_v56, %v1159_v30 }
 0x2da   : > { %3440 = vmatprep.subr.bf16.mxu1 %v4311_v27 }
 0x2dc   : > { %1299 = vmatpush1.bf16.msra.mxu0 %v3784_v33 }
 0x2dd   : > { %1300 = vmatprep.subr.bf16.mxu0 %v3785_v34  ;;  %3441 = vmatpush3.bf16.msra.mxu1 %v3800_v42 }
 0x2de   : > { %3442 = vmatprep.subr.bf16.mxu1 %v4311_v27  ;;  %p3308_p2 = scmp.ne.s32.totalorder %s5352_s13, 1 }
 0x2df   : > { %vm4317_vm10 = vmmov (!%p3308_p2), 0   ;;  %s5354_s21 = sld [smem:[#allocation41_spill]] (!%p3308_p2) }
 0x2e0   : > { %1301 = vmatpush1.bf16.msra.mxu0 %v3787_v37 }
 0x2e1   : > { %1302 = vmatprep.subr.bf16.mxu0 %v3788_v38  ;;  %3443 = vmatpush3.bf16.msra.mxu1 %v3801_v45 }
 0x2e2   : > { %3444 = vmatprep.subr.bf16.mxu1 %v4311_v27 }
 0x2e4   : > { %1303 = vmatpush1.bf16.msra.mxu0 %v3790_v40 }
 0x2e5   : > { %1304 = vmatprep.subr.bf16.mxu0 %v3791_v41  ;;  %3445 = vmatpush3.bf16.msra.mxu1 %v3802_v49 }
 0x2e6   : > { %3446 = vmatprep.subr.bf16.mxu1 %v4311_v27 }
 0x2e8   : > { %1305 = vmatpush1.bf16.msra.mxu0 %v3793_v43 }
 0x2e9   : > { %1306 = vmatprep.subr.bf16.mxu0 %v3794_v44  ;;  %3447 = vmatpush3.bf16.msra.mxu1 %v3803_v51 }
 0x2ea   : > { %3448 = vmatprep.subr.bf16.mxu1 %v4311_v27 }
 0x2ec   : > { %1307 = vmatpush1.bf16.msra.mxu0 %v3796_v46 }
 0x2ed   : > { %3478 = vmatprep.subr.bf16.mxu0 %v4311_v27  ;;  %3449 = vmatpush3.bf16.msra.mxu1 %v3804_v52 }
 0x2ee   : > { %3454 = vmatprep.subr.bf16.mxu1 %v4311_v27 }
 0x2ef   : > { %1325 = vmatmul.mubr.bf16.vlgmr.msra.gmra.mrb[0].mxu0 %v1146_v50 }
 0x2f0   : > { %3480 = vmatprep.mubr.msk.bf16.mxu0 %vm4312_vm4, %v4311_v27  ;;  %3451 = vmatmul.mubr.bf16.vlgmr.msra.gmra.mrb[0].mxu1 %v1146_v50 }
 0x2f1   : > { %3456 = vmatprep.mubr.msk.bf16.mxu1 %vm4312_vm4, %v4311_v27 }
 0x3c2   : > { %v1326_v60 = vpop.f32.mrb[0].mxu0 }
 0x3c3   : > { %v1328_v61 = vpop.f32.mrb[1].mxu0  ;;  %v1327_v0 = vadd.f32 %v1326_v60, %v1152_v59  ;;  %v1369_v13 = vpop.f32.mrb[0].mxu1 }
 0x3c4   : > { %v1329_v62 = vadd.f32 %v1328_v61, %v1156_v58  ;;  %v1330_v63 = vpop.f32.mrb[2].mxu0  ;;  %v3452_v14 = vpop.f32.mrb[1].mxu1  ;;  %v5024_v43 = vadd.f32 %v1369_v13, %v1160_v39 }
 0x3c5   : > { %v1331_v1 = vadd.f32 %v1330_v63, %v1152_v59  ;;  %v1332_v2 = vpop.f32.mrb[3].mxu0  ;;  %v1396_v10 = vpack.c.bf16 %v1327_v0, %v1327_v0  ;;  %v1372_v15 = vpop.f32.mrb[2].mxu1 }
 0x3c6   : > { %v1333_v3 = vadd.f32 %v1332_v2, %v1156_v58  ;;  %1406 = vrot.lane.b32.xlu0 %v1329_v62, %s4313_s2  ;;  %v1424_v4 = vpack.c.bf16 %v1329_v62, %v1329_v62  ;;  %v3453_v16 = vpop.f32.mrb[3].mxu1  ;;  %v1452_v52 = vpack.c.bf16 %v5024_v43, %v5024_v43  ;;  %v5039_v61 = vadd.f32 %v1372_v15, %v1160_v39 }
 0x3c7   : > { %1380 = vrot.lane.b32.xlu1 %v1331_v1, %s4313_s2  ;;  %v3728_v5 = vpack.i.bf16 %v1331_v1, %v1327_v0  ;;  %v1397_v12 = vpack.c.bf16 %v1331_v1, %v1331_v1 }
 0x3c8   : > { %v1465_v6 = vsel %vm1460_vm5, %v1424_v4, 0  ;;  %v3718_v7 = vpack.i.bf16 %v1333_v3, %v1327_v0  ;;  %v3723_v8 = vpack.i.bf16 %v1333_v3, %v1329_v62  ;;  %v1425_v9 = vpack.c.bf16 %v1333_v3, %v1333_v3 }
 0x3c9   : > { %3455 = vmatpush3.bf16.xpose.msra.mxu1 %v1465_v6  ;;  %v1939_v59 = vsel %vm1937_vm6, %v1452_v52, 0  ;;  %v1453_v0 = vpack.c.bf16 %v5039_v61, %v5039_v61 }
 0x3ca   : > { %3719 = vrot.lane.b32.xlu0 %v3718_v7, %s4313_s2  ;;  %3460 = vmatprep.subr.bf16.mxu1 %v4311_v27  ;;  %v1511_v11 = vsel %vm1460_vm5, %v1425_v9, 0 }
 0x3cb   : > { %3724 = vrot.lane.b32.xlu1 %v3723_v8, %s4314_s19  ;;  %v1985_v2 = vsel %vm1937_vm6, %v1453_v0, 0 }
 0x3ce   : > { %3729 = vrot.lane.b32.xlu0 %v3728_v5, %s4314_s19 }
 0x3cf   : > { %3734 = vrot.lane.b32.xlu1 %v3723_v8, %s4315_s3 }
 0x3d0   : > { %3457 = vmatmul.mubr.msk.bf16.vlgmr.msra.gmra.mrb[4].mxu1 %vm1460_vm5, %v1396_v10 }
 0x3d1   : > { %3461 = vmatpush3.bf16.xpose.msra.mxu1 %v1511_v11  ;;  %3462 = vmatprep.mubr.msk.bf16.mxu1 %vm4312_vm4, %v4311_v27 }
 0x3d2   : > { %3739 = vrot.lane.b32.xlu0 %v3728_v5, %s4315_s3  ;;  %3466 = vmatprep.subr.bf16.mxu1 %v4311_v27 }
 0x3d8   : > { %3463 = vmatmul.mubr.msk.bf16.vlgmr.msra.gmra.mrb[8].mxu1 %vm1460_vm5, %v1397_v12 }
 0x3d9   : > { %3468 = vmatprep.mubr.msk.bf16.mxu1 %vm4312_vm4, %v4311_v27 }
 0x438   : > { %v1407_v17 = vpop.permute.xlu0 %1406 }
 0x439   : > { %v1426_v18 = vpack.c.bf16 %v1407_v17, %v1407_v17  ;;  %v1381_v19 = vpop.permute.xlu1 %1380 }
 0x43a   : > { %v1399_v44 = vpack.c.bf16 %v1381_v19, %v1381_v19 }
 0x43b   : > { %v1557_v20 = vsel %vm1460_vm5, %v1426_v18, 0 }
 0x43c   : > { %v3720_v21 = vpop.permute.xlu0 %3719  ;;  %3467 = vmatpush3.bf16.xpose.msra.mxu1 %v1557_v20 }
 0x43d   : > { %v3722_v22 = vunpack.i.h.bf16 %v3720_v21  ;;  %v3721_v23 = vunpack.i.l.bf16 %v3720_v21  ;;  %v3725_v24 = vpop.permute.xlu1 %3724  ;;  %3472 = vmatprep.subr.bf16.mxu1 %v4311_v27 }
 0x43e   : > { %v3726_v25 = vunpack.i.l.bf16 %v3725_v24  ;;  %v3727_v36 = vunpack.i.h.bf16 %v3725_v24 }
 0x43f   : > { %v1427_v28 = vpack.c.bf16 %v3722_v22, %v3722_v22  ;;  %v1398_v31 = vpack.c.bf16 %v3721_v23, %v3721_v23 }
 0x440   : > { %v1428_v29 = vpack.c.bf16 %v3726_v25, %v3726_v25  ;;  %v3730_v32 = vpop.permute.xlu0 %3729  ;;  %v1429_v41 = vpack.c.bf16 %v3727_v36, %v3727_v36 }
 0x441   : > { %v3735_v33 = vpop.permute.xlu1 %3734  ;;  %v1603_v37 = vsel %vm1460_vm5, %v1427_v28, 0  ;;  %v3731_v38 = vunpack.i.l.bf16 %v3730_v32  ;;  %v3732_v53 = vunpack.i.h.bf16 %v3730_v32 }
 0x442   : > { %v3736_v34 = vunpack.i.l.bf16 %v3735_v33  ;;  %v1649_v35 = vsel %vm1460_vm5, %v1428_v29, 0  ;;  %v3737_v49 = vunpack.i.h.bf16 %v3735_v33  ;;  %v1695_v50 = vsel %vm1460_vm5, %v1429_v41, 0 }
 0x443   : > { %3469 = vmatmul.mubr.msk.bf16.vlgmr.msra.gmra.mrb[12].mxu1 %vm1460_vm5, %v1398_v31  ;;  %3479 = vmatpush3.bf16.xpose.msra.mxu0 %v1649_v35  ;;  %v1400_v42 = vpack.c.bf16 %v3731_v38, %v3731_v38  ;;  %v1401_v60 = vpack.c.bf16 %v3732_v53, %v3732_v53 }
 0x444   : > { %3473 = vmatpush3.bf16.xpose.msra.mxu1 %v1603_v37  ;;  %3474 = vmatprep.mubr.msk.bf16.mxu1 %vm4312_vm4, %v4311_v27  ;;  %v1430_v40 = vpack.c.bf16 %v3736_v34, %v3736_v34  ;;  %v3740_v45 = vpop.permute.xlu0 %3739  ;;  %v1431_v56 = vpack.c.bf16 %v3737_v49, %v3737_v49 }
 0x445   : > { %3490 = vmatprep.subr.bf16.mxu0 %v4311_v27  ;;  %3484 = vmatprep.subr.bf16.mxu1 %v4311_v27  ;;  %v3741_v51 = vunpack.i.l.bf16 %v3740_v45  ;;  %v3742_v63 = vunpack.i.h.bf16 %v3740_v45 }
 0x446   : > { %v1741_v46 = vsel %vm1460_vm5, %v1430_v40, 0  ;;  %v1787_v62 = vsel %vm1460_vm5, %v1431_v56, 0 }
 0x447   : > { %v1402_v58 = vpack.c.bf16 %v3741_v51, %v3741_v51  ;;  %v1403_v1 = vpack.c.bf16 %v3742_v63, %v3742_v63 }
 0x44a   : > { %3481 = vmatmul.mubr.msk.bf16.vlgmr.msra.gmra.mrb[4].mxu0 %vm1460_vm5, %v1400_v42 }
 0x44b   : > { %3475 = vmatmul.mubr.msk.bf16.vlgmr.msra.gmra.mrb[16].mxu1 %vm1460_vm5, %v1399_v44  ;;  %3491 = vmatpush3.bf16.xpose.msra.mxu0 %v1741_v46 }
 0x44c   : > { %3485 = vmatpush3.bf16.xpose.msra.mxu1 %v1695_v50  ;;  %3492 = vmatprep.mubr.msk.bf16.mxu0 %vm4312_vm4, %v4311_v27 }
 0x44d   : > { %3486 = vmatprep.mubr.msk.bf16.mxu1 %vm4312_vm4, %v4311_v27  ;;  %3496 = vmatprep.subr.bf16.mxu1 %v4311_v27 }
 0x44e   : > { %3502 = vmatprep.subr.bf16.mxu0 %v4311_v27 }
 0x452   : > { %3493 = vmatmul.mubr.msk.bf16.vlgmr.msra.gmra.mrb[8].mxu0 %vm1460_vm5, %v1402_v58 }
 0x453   : > { %3487 = vmatmul.mubr.msk.bf16.vlgmr.msra.gmra.mrb[20].mxu1 %vm1460_vm5, %v1401_v60  ;;  %3503 = vmatpush3.bf16.msra.mxu0 %v1939_v59 }
 0x454   : > { %3497 = vmatpush3.bf16.xpose.msra.mxu1 %v1787_v62  ;;  %3498 = vmatprep.mubr.msk.bf16.mxu1 %vm4312_vm4, %v4311_v27 }
 0x455   : > { %3508 = vmatprep.subr.bf16.mxu1 %v4311_v27  ;;  %3504 = vmatprep.mubr.msk.bf16.mxu0 %vm4312_vm4, %v4311_v27 }
 0x456   : > { %3514 = vmatprep.subr.bf16.mxu0 %v4311_v27 }
 0x45b   : > { %3499 = vmatmul.mubr.msk.bf16.vlgmr.msra.gmra.mrb[24].mxu1 %vm1460_vm5, %v1403_v1 }
 0x45c   : > { %3509 = vmatpush3.bf16.msra.mxu1 %v1985_v2  ;;  %3510 = vmatprep.mubr.msk.bf16.mxu1 %vm4312_vm4, %v4311_v27 }
 0x45d   : > { %3520 = vmatprep.subr.bf16.mxu1 %v4311_v27 }
 0x4a3   : > { %v1501_v3 = vpop.f32.mrb[4].mxu1 }
 0x4a4   : > { %v1829_v4 = vmul.f32 0.17677669, %v1501_v3  ;;  %v3458_v5 = vpop.f32.mrb[5].mxu1 }
 0x4a5   : > { %v1504_v6 = vpop.f32.mrb[6].mxu1 }
 0x4a6   : > { %v3459_v7 = vpop.f32.mrb[7].mxu1  ;;  %v1838_v8 = vsel %vm1837_vm7, %v1829_v4, -inf }
 0x4a7   : > { %1839 = vmax.xlane.f32.xlu1 %v1838_v8 }
 0x4ab   : > { %v1547_v9 = vpop.f32.mrb[8].mxu1 }
 0x4ac   : > { %v1830_v10 = vmul.f32 0.17677669, %v1547_v9  ;;  %v3464_v11 = vpop.f32.mrb[9].mxu1 }
 0x4ad   : > { %v1550_v12 = vpop.f32.mrb[10].mxu1 }
 0x4ae   : > { %v3465_v13 = vpop.f32.mrb[11].mxu1  ;;  %v1841_v14 = vsel %vm1837_vm7, %v1830_v10, -inf }
 0x4af   : > { %1842 = vmax.xlane.f32.xlu0 %v1841_v14 }
 0x516   : > { %v1593_v15 = vpop.f32.mrb[12].mxu1 }
 0x517   : > { %v1831_v16 = vmul.f32 0.17677669, %v1593_v15  ;;  %v3470_v17 = vpop.f32.mrb[13].mxu1 }
 0x518   : > { %v1596_v18 = vpop.f32.mrb[14].mxu1 }
 0x519   : > { %v3471_v19 = vpop.f32.mrb[15].mxu1  ;;  %v1844_v20 = vsel %vm1837_vm7, %v1831_v16, -inf }
 0x51a   : > { %1845 = vmax.xlane.f32.xlu0 %v1844_v20 }
 0x51d   : > { %v1685_v21 = vpop.f32.mrb[4].mxu0 }
 0x51e   : > { %v1833_v22 = vmul.f32 0.17677669, %v1685_v21  ;;  %v1639_v23 = vpop.f32.mrb[16].mxu1  ;;  %v3482_v24 = vpop.f32.mrb[5].mxu0 }
 0x51f   : > { %v1832_v25 = vmul.f32 0.17677669, %v1639_v23  ;;  %v3476_v28 = vpop.f32.mrb[17].mxu1  ;;  %v1688_v29 = vpop.f32.mrb[6].mxu0 }
 0x520   : > { %v1642_v30 = vpop.f32.mrb[18].mxu1  ;;  %v3483_v31 = vpop.f32.mrb[7].mxu0  ;;  %v1850_v32 = vsel %vm1837_vm7, %v1833_v22, -inf  ;;  %v3748_v28 = vpack.i.bf16 %v5039_v61, %v5024_v43 }
 0x521   : > { %1851 = vmax.xlane.f32.xlu0 %v1850_v32  ;;  %v3477_v33 = vpop.f32.mrb[19].mxu1  ;;  %v1847_v34 = vsel %vm1837_vm7, %v1832_v25, -inf }
 0x522   : > { %1848 = vmax.xlane.f32.xlu1 %v1847_v34 }
 0x525   : > { %v1777_v35 = vpop.f32.mrb[8].mxu0 }
 0x526   : > { %v1835_v36 = vmul.f32 0.17677669, %v1777_v35  ;;  %v1731_v37 = vpop.f32.mrb[20].mxu1  ;;  %v3494_v38 = vpop.f32.mrb[9].mxu0 }
 0x527   : > { %v5062_v39 = vmul.f32 0.17677669, %v1731_v37  ;;  %v3488_v40 = vpop.f32.mrb[21].mxu1  ;;  %v1780_v41 = vpop.f32.mrb[10].mxu0 }
 0x528   : > { %v1734_v42 = vpop.f32.mrb[22].mxu1  ;;  %v3495_v44 = vpop.f32.mrb[11].mxu0  ;;  %v1856_v45 = vsel %vm1837_vm7, %v1835_v36, -inf }
 0x529   : > { %1857 = vmax.xlane.f32.xlu0 %v1856_v45  ;;  %v3489_v46 = vpop.f32.mrb[23].mxu1  ;;  %v1853_v49 = vsel %vm1837_vm7, %v5062_v39, -inf }
 0x52a   : > { %1854 = vmax.xlane.f32.xlu1 %v1853_v49 }
 0x52e   : > { %v1823_v50 = vpop.f32.mrb[24].mxu1 }
 0x52f   : > { %v5067_v51 = vmul.f32 0.17677669, %v1823_v50  ;;  %v3500_v52 = vpop.f32.mrb[25].mxu1 }
 0x530   : > { %v1826_v53 = vpop.f32.mrb[26].mxu1 }
 0x531   : > { %v3501_v56 = vpop.f32.mrb[27].mxu1  ;;  %v1859_v58 = vsel %vm1837_vm7, %v5067_v51, -inf }
 0x532   : > { %1860 = vmax.xlane.f32.xlu1 %v1859_v58 }
 0x534   : > { %v1840_v59 = vpop.xlane.xlu1 %1839 }
 0x535   : > { %v1862_v60 = vsub.f32 %v1829_v4, %v1840_v59 }
 0x537   : > { %v1870_v62 = vmul.f32 1.442695, %v1862_v60 }
 0x539   : > { %3853 = vpow2.f32 %v1870_v62 }
 0x53c   : > { %v1843_v63 = vpop.xlane.xlu0 %1842 }
 0x53d   : > { %v1863_v0 = vsub.f32 %v1830_v10, %v1843_v63 }
 0x53f   : > { %v1872_v1 = vmul.f32 1.442695, %v1863_v0 }
 0x541   : > { %3855 = vpow2.f32 %v1872_v1 }
 0x543   : > { %v3854_v2 = vpop.eup %3853 }
 0x544   : > { %v1886_v3 = vsel %vm1837_vm7, %v3854_v2, 0.0 }
 0x545   : > { %1887 = vadd.xlane.f32.xlu0 %v1886_v3 }
 0x54b   : > { %v3856_v5 = vpop.eup %3855 }
 0x54c   : > { %v1889_v6 = vsel %vm1837_vm7, %v3856_v5, 0.0 }
 0x54d   : > { %1890 = vadd.xlane.f32.xlu1 %v1889_v6 }
 0x5a7   : > { %v1846_v7 = vpop.xlane.xlu0 %1845 }
 0x5a8   : > { %v1864_v8 = vsub.f32 %v1831_v16, %v1846_v7 }
 0x5aa   : > { %v1874_v9 = vmul.f32 1.442695, %v1864_v8 }
 0x5ac   : > { %3857 = vpow2.f32 %v1874_v9 }
 0x5ae   : > { %v1852_v11 = vpop.xlane.xlu0 %1851 }
 0x5af   : > { %v1866_v4 = vsub.f32 %v1833_v22, %v1852_v11  ;;  %v1849_v12 = vpop.xlane.xlu1 %1848 }
 0x5b0   : > { %v1865_v13 = vsub.f32 %v1832_v25, %v1849_v12 }
 0x5b1   : > { %v1878_v14 = vmul.f32 1.442695, %v1866_v4 }
 0x5b2   : > { %v1876_v10 = vmul.f32 1.442695, %v1865_v13 }
 0x5b3   : > { %3859 = vpow2.f32 %v1878_v14 }
 0x5b4   : > { %3861 = vpow2.f32 %v1876_v10 }
 0x5b6   : > { %v5073_v15 = vpop.eup %3857  ;;  %v1858_v17 = vpop.xlane.xlu0 %1857 }
 0x5b7   : > { %v1868_v18 = vsub.f32 %v1835_v36, %v1858_v17  ;;  %v1892_v19 = vsel %vm1837_vm7, %v5073_v15, 0.0  ;;  %v1855_v29 = vpop.xlane.xlu1 %1854 }
 0x5b8   : > { %1893 = vadd.xlane.f32.xlu0 %v1892_v19  ;;  %v1867_v35 = vsub.f32 %v5062_v39, %v1855_v29 }
 0x5b9   : > { %v1882_v20 = vmul.f32 1.442695, %v1868_v18 }
 0x5ba   : > { %v1880_v37 = vmul.f32 1.442695, %v1867_v35 }
 0x5bb   : > { %3863 = vpow2.f32 %v1882_v20 }
 0x5bd   : > { %v5077_v16 = vpop.eup %3859 }
 0x5be   : > { %v3862_v21 = vpop.eup %3861  ;;  %v1898_v22 = vsel %vm1837_vm7, %v5077_v16, 0.0 }
 0x5bf   : > { %1899 = vadd.xlane.f32.xlu0 %v1898_v22  ;;  %v1895_v23 = vsel %vm1837_vm7, %v3862_v21, 0.0  ;;  %v1861_v31 = vpop.xlane.xlu1 %1860 }
 0x5c0   : > { %1896 = vadd.xlane.f32.xlu1 %v1895_v23  ;;  %v1869_v43 = vsub.f32 %v5067_v51, %v1861_v31 }
 0x5c2   : > { %v1884_v40 = vmul.f32 1.442695, %v1869_v43 }
 0x5c5   : > { %v5082_v24 = vpop.eup %3863 }
 0x5c6   : > { %v1904_v25 = vsel %vm1837_vm7, %v5082_v24, 0.0 }
 0x5c7   : > { %1905 = vadd.xlane.f32.xlu0 %v1904_v25 }
 0x5d1   : > { %3749 = vrot.lane.b32.xlu1 %v3748_v28, %s4314_s19 }
 0x5d2   : > { %v1888_v30 = vpop.xlane.xlu0 %1887 }
 0x5d3   : > { %3865 = vrcp.f32 %v1888_v30 }
 0x5da   : > { %v1891_v32 = vpop.xlane.xlu1 %1890 }
 0x5db   : > { %3867 = vrcp.f32 %v1891_v32 }
 0x5dc   : > { %3869 = vpow2.f32 %v1880_v37 }
 0x5dd   : > { %v3866_v33 = vpop.eup %3865  ;;  %3744 = vrot.lane.b32.xlu0 %v3748_v28, %s4313_s2  ;;  %3871 = vpow2.f32 %v1884_v40 }
 0x5de   : > { %v1911_v34 = vmul.f32 %v3866_v33, %v3854_v2 }
 0x5e0   : > { %v1926_v36 = vpack.c.bf16 %v1911_v34, %v1911_v34 }
 0x5e2   : > { %3505 = vmatmul.mubr.msk.bf16.vlgmr.msra.gmra.mrb[12].mxu0 %vm1837_vm7, %v1926_v36 }
 0x5e3   : > { %3516 = vmatprep.mubr.msk.bf16.mxu0 %vm4312_vm4, %v4311_v27 }
 0x5e5   : > { %v3868_v61 = vpop.eup %3867 }
 0x5e6   : > { %v1913_v38 = vmul.f32 %v3868_v61, %v3856_v5  ;;  %v5098_v39 = vpop.eup %3869 }
 0x5e7   : > { %v1901_v42 = vsel %vm1837_vm7, %v5098_v39, 0.0  ;;  %v5102_v44 = vpop.eup %3871 }
 0x5e8   : > { %v1927_v41 = vpack.c.bf16 %v1913_v38, %v1913_v38  ;;  %v1907_v45 = vsel %vm1837_vm7, %v5102_v44, 0.0 }
 0x5ea   : > { %3511 = vmatmul.mubr.msk.bf16.vlgmr.msra.gmra.mrb[28].mxu1 %vm1837_vm7, %v1927_v41 }
 0x5eb   : > { %3522 = vmatprep.mubr.msk.bf16.mxu1 %vm4312_vm4, %v4311_v27 }
 0x5f5   : > { %1902 = vadd.xlane.f32.xlu1 %v1901_v42  ;;  %v3806_v42 = vld [vmem:[%s4855_s29 + $0x8] sm:$0xff]  }
 0x5f9   : > { %1908 = vadd.xlane.f32.xlu1 %v1907_v45 }
 0x60a   : > { %3754 = vrot.lane.b32.xlu1 %v3748_v28, %s4315_s3 }
 0x645   : > { %v1894_v46 = vpop.xlane.xlu0 %1893 }
 0x646   : > { %3873 = vrcp.f32 %v1894_v46 }
 0x64c   : > { %v1900_v50 = vpop.xlane.xlu0 %1899 }
 0x64d   : > { %v1897_v49 = vpop.xlane.xlu1 %1896 }
 0x64e   : > { %3875 = vrcp.f32 %v1897_v49 }
 0x64f   : > { %3877 = vrcp.f32 %v1900_v50 }
 0x650   : > { %v3874_v53 = vpop.eup %3873 }
 0x651   : > { %v3750_v52 = vpop.permute.xlu1 %3749  ;;  %v1915_v0 = vmul.f32 %v3874_v53, %v5073_v15  ;;  %v3808_v53 = vld [vmem:[%s4855_s29 + $0x18] sm:$0xff]  }
 0x652   : > { %v3752_v59 = vunpack.i.h.bf16 %v3750_v52  ;;  %v3751_v60 = vunpack.i.l.bf16 %v3750_v52 }
 0x653   : > { %v1928_v9 = vpack.c.bf16 %v1915_v0, %v1915_v0 }
 0x654   : > { %v1906_v51 = vpop.xlane.xlu0 %1905  ;;  %v1457_v5 = vpack.c.bf16 %v3752_v59, %v3752_v59  ;;  %v1456_v6 = vpack.c.bf16 %v3751_v60, %v3751_v60  ;;  %v3809_v59 = vld [vmem:[%s4855_s29 + $0x20] sm:$0xff]  }
 0x655   : > { %3879 = vrcp.f32 %v1906_v51 }
 0x656   : > { %v2123_v12 = vsel %vm1937_vm6, %v1456_v6, 0  ;;  %v2169_v13 = vsel %vm1937_vm6, %v1457_v5, 0 }
 0x658   : > { %v3876_v56 = vpop.eup %3875  ;;  %v3745_v58 = vpop.permute.xlu0 %3744 }
 0x659   : > { %v3747_v62 = vunpack.i.h.bf16 %v3745_v58  ;;  %v3746_v63 = vunpack.i.l.bf16 %v3745_v58  ;;  %v1917_v1 = vmul.f32 %v3876_v56, %v3862_v21  ;;  %v3878_v4 = vpop.eup %3877 }
 0x65a   : > { %v1919_v14 = vmul.f32 %v3878_v4, %v5077_v16 }
 0x65b   : > { %v1455_v2 = vpack.c.bf16 %v3747_v62, %v3747_v62  ;;  %v1454_v3 = vpack.c.bf16 %v3746_v63, %v3746_v63  ;;  %v1929_v11 = vpack.c.bf16 %v1917_v1, %v1917_v1  ;;  %v3810_v1 = vld [vmem:[%s4855_s29 + $0x28] sm:$0xff]  }
 0x65c   : > { %v1930_v10 = vpack.c.bf16 %v1919_v14, %v1919_v14 }
 0x65d   : > { %v2031_v7 = vsel %vm1937_vm6, %v1454_v3, 0  ;;  %v2077_v8 = vsel %vm1937_vm6, %v1455_v2, 0  ;;  %v3811_v2 = vld [vmem:[%s4855_s29 + $0x30] sm:$0xff]   ;;  %v3812_v3 = vld [vmem:[%s4855_s29 + $0x38] sm:$0xff]  }
 0x65e   : > { %3515 = vmatpush3.bf16.msra.mxu0 %v2031_v7  ;;  %3521 = vmatpush3.bf16.msra.mxu1 %v2077_v8 }
 0x65f   : > { %3526 = vmatprep.subr.bf16.mxu0 %v4311_v27  ;;  %3532 = vmatprep.subr.bf16.mxu1 %v4311_v27  ;;  %v3880_v18 = vpop.eup %3879 }
 0x660   : > { %v1923_v22 = vmul.f32 %v3880_v18, %v5082_v24 }
 0x661   : > { %3517 = vmatmul.mubr.msk.bf16.vlgmr.msra.gmra.mrb[16].mxu0 %vm1837_vm7, %v1928_v9  ;;  %3523 = vmatmul.mubr.msk.bf16.vlgmr.msra.gmra.mrb[32].mxu1 %vm1837_vm7, %v1929_v11 }
 0x662   : > { %3527 = vmatpush3.bf16.msra.mxu0 %v2123_v12  ;;  %3533 = vmatpush3.bf16.msra.mxu1 %v2169_v13  ;;  %v1932_v32 = vpack.c.bf16 %v1923_v22, %v1923_v22 }
 0x663   : > { %3528 = vmatprep.mubr.msk.bf16.mxu0 %vm4312_vm4, %v4311_v27  ;;  %3538 = vmatprep.subr.bf16.mxu0 %v4311_v27 }
 0x664   : > { %3534 = vmatprep.mubr.msk.bf16.mxu1 %vm4312_vm4, %v4311_v27  ;;  %3544 = vmatprep.subr.bf16.mxu1 %v4311_v27 }
 0x669   : > { %3529 = vmatmul.mubr.msk.bf16.vlgmr.msra.gmra.mrb[20].mxu0 %vm1837_vm7, %v1930_v10 }
 0x66a   : > { %3540 = vmatprep.mubr.msk.bf16.mxu0 %vm4312_vm4, %v4311_v27 }
 0x682   : > { %v1903_v15 = vpop.xlane.xlu1 %1902 }
 0x683   : > { %3881 = vrcp.f32 %v1903_v15 }
 0x686   : > { %v1909_v17 = vpop.xlane.xlu1 %1908 }
 0x687   : > { %3883 = vrcp.f32 %v1909_v17 }
 0x68a   : > { %v3755_v19 = vpop.permute.xlu1 %3754 }
 0x68b   : > { %v3757_v20 = vunpack.i.h.bf16 %v3755_v19  ;;  %v3756_v16 = vunpack.i.l.bf16 %v3755_v19 }
 0x68d   : > { %v3882_v21 = vpop.eup %3881  ;;  %v1458_v23 = vpack.c.bf16 %v3756_v16, %v3756_v16  ;;  %v1459_v28 = vpack.c.bf16 %v3757_v20, %v3757_v20 }
 0x68e   : > { %v1921_v25 = vmul.f32 %v3882_v21, %v5098_v39  ;;  %v3805_v39 = vld [vmem:[%s4855_s29] sm:$0xff]  }
 0x68f   : > { %v2215_v29 = vsel %vm1937_vm6, %v1458_v23, 0  ;;  %v2261_v33 = vsel %vm1937_vm6, %v1459_v28, 0 }
 0x690   : > { %3539 = vmatpush3.bf16.msra.mxu0 %v2215_v29  ;;  %v1931_v30 = vpack.c.bf16 %v1921_v25, %v1921_v25 }
 0x691   : > { %v3884_v31 = vpop.eup %3883  ;;  %3550 = vmatprep.subr.bf16.mxu0 %v4311_v27 }
 0x692   : > { %3535 = vmatmul.mubr.msk.bf16.vlgmr.msra.gmra.mrb[36].mxu1 %vm1837_vm7, %v1931_v30  ;;  %v1925_v24 = vmul.f32 %v3884_v31, %v5102_v44  ;;  %v3807_v44 = vld [vmem:[%s4855_s29 + $0x10] sm:$0xff]   ;;  %s5346_s29 = scalar_lea.vmem [#allocation8], %s4836_s28 }
 0x693   : > { %3545 = vmatpush3.bf16.msra.mxu1 %v2261_v33  ;;  %3541 = vmatmul.mubr.msk.bf16.vlgmr.msra.gmra.mrb[24].mxu0 %vm1837_vm7, %v1932_v32 }
 0x694   : > { %3546 = vmatprep.mubr.msk.bf16.mxu1 %vm4312_vm4, %v4311_v27  ;;  %3566 = vmatprep.mubr.msk.bf16.mxu0 %vm4312_vm4, %v4311_v27  ;;  %v1933_v34 = vpack.c.bf16 %v1925_v24, %v1925_v24 }
 0x695   : > { %3551 = vmatpush3.bf16.msra.mxu0 %v3805_v39 }
 0x696   : > { %3552 = vmatprep.subr.bf16.mxu0 %v4311_v27 }
 0x699   : > { %3553 = vmatpush3.bf16.msra.mxu0 %v3806_v42 }
 0x69a   : > { %3547 = vmatmul.mubr.msk.bf16.vlgmr.msra.gmra.mrb[40].mxu1 %vm1837_vm7, %v1933_v34  ;;  %3554 = vmatprep.subr.bf16.mxu0 %v4311_v27 }
 0x69b   : > { %2604 = vmatprep.mubr.bf16.mxu1 %v4310_v26 }
 0x69d   : > { %3555 = vmatpush3.bf16.msra.mxu0 %v3807_v44 }
 0x69e   : > { %3556 = vmatprep.subr.bf16.mxu0 %v4311_v27 }
 0x6a1   : > { %3557 = vmatpush3.bf16.msra.mxu0 %v3808_v53  ;;  %v3825_v53 = vld [vmem:[%s4864_s22 + $0x40] ss:$8 sps:$4 sm:$0xff]  }
 0x6a2   : > { %3558 = vmatprep.subr.bf16.mxu0 %v4311_v27 }
 0x6a5   : > { %3559 = vmatpush3.bf16.msra.mxu0 %v3809_v59  ;;  %v3833_v59 = vld [vmem:[%s4864_s22 + $0x64] ss:$8 sps:$4 sm:$0xff]  }
 0x6a6   : > { %3560 = vmatprep.subr.bf16.mxu0 %v4311_v27 }
 0x6a9   : > { %3561 = vmatpush3.bf16.msra.mxu0 %v3810_v1  ;;  %v3838_v1 = vld [vmem:[%s4872_s0] sm:$0xff]  }
 0x6aa   : > { %3562 = vmatprep.subr.bf16.mxu0 %v4311_v27 }
 0x6ad   : > { %3563 = vmatpush3.bf16.msra.mxu0 %v3811_v2  ;;  %v3839_v2 = vld [vmem:[%s4872_s0 + $0x48] sm:$0xff]  }
 0x6ae   : > { %3564 = vmatprep.subr.bf16.mxu0 %v4311_v27 }
 0x6b1   : > { %3565 = vmatpush3.bf16.msra.mxu0 %v3812_v3  ;;  %v3840_v3 = vld [vmem:[%s4872_s0 + $0x8] sm:$0xff]  }
 0x6b5   : > { %v5140_v35 = vpop.f32.mrb[12].mxu0 }
 0x6b6   : > { %v3506_v36 = vpop.f32.mrb[13].mxu0 }
 0x6b7   : > { %v1978_v37 = vpop.f32.mrb[14].mxu0  ;;  %v3813_v36 = vld [vmem:[%s4864_s22] ss:$8 sps:$4 sm:$0xff]  }
 0x6b8   : > { %v3507_v43 = vpop.f32.mrb[15].mxu0  ;;  %v3815_v37 = vld [vmem:[%s4864_s22 + $0x4] ss:$8 sps:$4 sm:$0xff]  }
 0x6b9   : > { %2572 = vmatprep.subr.bf16.mxu1 %v3815_v37  ;;  %v3262_v43 = vld [vmem:[%s5346_s29] ss:$0 sm:$0xff] }
 0x6ba   : > { %2573 = vmatpush1.bf16.msra.mxu1 %v3813_v36 }
 0x6bd   : > { %v5142_v61 = vpop.f32.mrb[28].mxu1 }
 0x6be   : > { %v3512_v38 = vpop.f32.mrb[29].mxu1 }
 0x6bf   : > { %v2024_v40 = vpop.f32.mrb[30].mxu1 }
 0x6c0   : > { %v3513_v41 = vpop.f32.mrb[31].mxu1 }
 0x734   : > { %v2067_v26 = vpop.f32.mrb[16].mxu0  ;;  %v2113_v45 = vpop.f32.mrb[32].mxu1 }
 0x735   : > { %v3758_v46 = vpack.i.bf16 %v2113_v45, %v2067_v26  ;;  %v3518_v49 = vpop.f32.mrb[17].mxu0  ;;  %v3524_v50 = vpop.f32.mrb[33].mxu1  ;;  %v3818_v45 = vld [vmem:[%s4864_s22 + $0x14] ss:$8 sps:$4 sm:$0xff]  }
 0x736   : > { %v2070_v51 = vpop.f32.mrb[18].mxu0  ;;  %v2116_v52 = vpop.f32.mrb[34].mxu1  ;;  %2574 = vmatprep.subr.bf16.mxu1 %v3818_v45  ;;  %v3819_v49 = vld [vmem:[%s4864_s22 + $0x20] ss:$8 sps:$4 sm:$0xff]   ;;  %v3824_v50 = vld [vmem:[%s4864_s22 + $0x34] ss:$8 sps:$4 sm:$0xff]  }
 0x737   : > { %v3519_v56 = vpop.f32.mrb[19].mxu0  ;;  %3759 = vrot.lane.b32.xlu0 %v3758_v46, %s4315_s3  ;;  %v3525_v58 = vpop.f32.mrb[35].mxu1  ;;  %v3816_v46 = vld [vmem:[%s4864_s22 + $0x10] ss:$8 sps:$4 sm:$0xff]   ;;  %v3827_v52 = vld [vmem:[%s4864_s22 + $0x44] ss:$8 sps:$4 sm:$0xff]  }
 0x738   : > { %2575 = vmatpush1.bf16.msra.mxu1 %v3816_v46  ;;  %v3822_v51 = vld [vmem:[%s4864_s22 + $0x30] ss:$8 sps:$4 sm:$0xff]   ;;  %v3830_v56 = vld [vmem:[%s4864_s22 + $0x54] ss:$8 sps:$4 sm:$0xff]  }
 0x739   : > { %v3828_v58 = vld [vmem:[%s4864_s22 + $0x50] ss:$8 sps:$4 sm:$0xff]  }
 0x73c   : > { %v2159_v60 = vpop.f32.mrb[20].mxu0 }
 0x73d   : > { %v3530_v62 = vpop.f32.mrb[21].mxu0 }
 0x73e   : > { %v2162_v63 = vpop.f32.mrb[22].mxu0  ;;  %v3836_v62 = vld [vmem:[%s4864_s22 + $0x74] ss:$8 sps:$4 sm:$0xff]  }
 0x73f   : > { %v3531_v0 = vpop.f32.mrb[23].mxu0  ;;  %v3834_v63 = vld [vmem:[%s4864_s22 + $0x70] ss:$8 sps:$4 sm:$0xff]  }
 0x740   : > { %v3837_v0 = vld [vmem:[%s4872_s0 + $0x40] sm:$0xff]  }
 0x741   : > { %3383 = vmatprep.subr.bf16.mxu0 %v3837_v0 }
 0x765   : > { %v2205_v5 = vpop.f32.mrb[36].mxu1 }
 0x766   : > { %v3763_v6 = vpack.i.bf16 %v2205_v5, %v2159_v60  ;;  %v3536_v7 = vpop.f32.mrb[37].mxu1  ;;  %v2251_v8 = vpop.f32.mrb[24].mxu0  ;;  %v3831_v60 = vld [vmem:[%s4864_s22 + $0x60] ss:$8 sps:$4 sm:$0xff]   ;;  %v3841_v5 = vld [vmem:[%s4872_s0 + $0x50] sm:$0xff]  }
 0x767   : > { %v2208_v9 = vpop.f32.mrb[38].mxu1  ;;  %v3542_v11 = vpop.f32.mrb[25].mxu0  ;;  %v3843_v7 = vld [vmem:[%s4872_s0 + $0x58] sm:$0xff]  }
 0x768   : > { %v2254_v4 = vpop.f32.mrb[26].mxu0  ;;  %3764 = vrot.lane.b32.xlu1 %v3763_v6, %s4314_s19  ;;  %v3537_v12 = vpop.f32.mrb[39].mxu1  ;;  %v3842_v6 = vld [vmem:[%s4872_s0 + $0x10] sm:$0xff]   ;;  %v3845_v9 = vld [vmem:[%s4872_s0 + $0x60] sm:$0xff]  }
 0x769   : > { %v3543_v13 = vpop.f32.mrb[27].mxu0  ;;  %v3846_v11 = vld [vmem:[%s4872_s0 + $0x20] sm:$0xff]   ;;  %v3847_v4 = vld [vmem:[%s4872_s0 + $0x68] sm:$0xff]  }
 0x76d   : > { %v2297_v14 = vpop.f32.mrb[40].mxu1 }
 0x76e   : > { %v3768_v10 = vpack.i.bf16 %v2297_v14, %v2251_v8  ;;  %v3548_v15 = vpop.f32.mrb[41].mxu1  ;;  %v3844_v8 = vld [vmem:[%s4872_s0 + $0x18] sm:$0xff]  }
 0x76f   : > { %v2300_v17 = vpop.f32.mrb[42].mxu1 }
 0x770   : > { %3769 = vrot.lane.b32.xlu0 %v3768_v10, %s4313_s2  ;;  %v3549_v27 = vpop.f32.mrb[43].mxu1 }
 0x7a9   : > { %v3760_v18 = vpop.permute.xlu0 %3759 }
 0x7aa   : > { %v3762_v20 = vunpack.i.h.bf16 %v3760_v18  ;;  %v3761_v16 = vunpack.i.l.bf16 %v3760_v18 }
 0x7ac   : > { %v2328_v25 = vsel %vm1460_vm5, %v5142_v61, %v3762_v20  ;;  %v2327_v28 = vsel %vm1460_vm5, %v5140_v35, %v3761_v16 }
 0x7da   : > { %v3765_v19 = vpop.permute.xlu1 %3764 }
 0x7db   : > { %v3767_v21 = vunpack.i.h.bf16 %v3765_v19  ;;  %v3766_v22 = vunpack.i.l.bf16 %v3765_v19 }
 0x7dd   : > { %v2331_v31 = vsel %vm2329_vm8, %v2328_v25, %v3767_v21  ;;  %v2330_v32 = vsel %vm2329_vm8, %v2327_v28, %v3766_v22 }
 0x7e2   : > { %v3770_v23 = vpop.permute.xlu0 %3769 }
 0x7e3   : > { %v3772_v29 = vunpack.i.h.bf16 %v3770_v23  ;;  %v3771_v30 = vunpack.i.l.bf16 %v3770_v23 }
 0x7e5   : > { %v2334_v33 = vsel %vm2332_vm9, %v2331_v31, %v3772_v29  ;;  %v2333_v24 = vsel %vm2332_vm9, %v2330_v32, %v3771_v30  ;;  %v3271_v29 = vld [vmem:[%s912_s27] ss:$0 sm:$0xff] }
 0x7e6   : > { %v2335_v34 = vpack.c.bf16 %v2334_v33, %v2333_v24 }
 0x7e8   : > { %3567 = vmatmul.mubr.bf16.vlgmr.msra.gmra.mrb[28].mxu0 %v2335_v34  ;;  %v3272_v34 = vld [vmem:[%s5348_s30] ss:$0 sm:$0xff] }
 0x7e9   : > { %3384 = vmatpush3.bf16.msra.mxu0 %v3838_v1 }
 0x7ea   : > { %3385 = vmatprep.subr.bf16.mxu0 %v3839_v2 }
 0x7ed   : > { %3386 = vmatpush3.bf16.msra.mxu0 %v3840_v3 }
 0x7ee   : > { %3387 = vmatprep.subr.bf16.mxu0 %v3841_v5 }
 0x7f1   : > { %3388 = vmatpush3.bf16.msra.mxu0 %v3842_v6 }
 0x7f2   : > { %3389 = vmatprep.subr.bf16.mxu0 %v3843_v7 }
 0x7f5   : > { %3390 = vmatpush3.bf16.msra.mxu0 %v3844_v8 }
 0x7f6   : > { %3391 = vmatprep.subr.bf16.mxu0 %v3845_v9 }
 0x7f9   : > { %3392 = vmatpush3.bf16.msra.mxu0 %v3846_v11 }
 0x7fa   : > { %3393 = vmatprep.subr.bf16.mxu0 %v3847_v4 }
 0x8bb   : > { %v2425_v61 = vpop.f32.mrb[28].mxu0 }
 0x8bc   : > { %v2426_v38 = vadd.f32 %v3262_v43, %v2425_v61  ;;  %v3568_v40 = vpop.f32.mrb[29].mxu0 }
 0x8bd   : > { %v2428_v35 = vpop.f32.mrb[30].mxu0  ;;  %v3849_v40 = vld [vmem:[%s4872_s0 + $0x70] sm:$0xff]  }
 0x8be   : > { %v5171_v41 = vadd.f32 %v2426_v38, %v4962_v47  ;;  %v2429_v39 = vadd.f32 %v3262_v43, %v2428_v35  ;;  %v3569_v42 = vpop.f32.mrb[31].mxu0  ;;  %v3848_v38 = vld [vmem:[%s4872_s0 + $0x28] sm:$0xff]   ;;  %v3850_v35 = vld [vmem:[%s4872_s0 + $0x30] sm:$0xff]  }
 0x8bf   : > { %3394 = vmatpush3.bf16.msra.mxu0 %v3848_v38  ;;  %v2480_v42 = vld [vmem:[%s4866_s24] sm:$0x3]  ;;  %s5349_s24 = scalar_lea.vmem [#allocation14], %s4836_s28 }
 0x8c0   : > { %v5174_v44 = vadd.f32 %v2429_v39, %v4964_v48  ;;  %2434 = vadd.xlane.f32.xlu1 %v5171_v41  ;;  %v2441_v47 = vmul.f32 %v5171_v41, %v5171_v41  ;;  %v3821_v48 = vld [vmem:[%s4864_s22 + $0x24] ss:$8 sps:$4 sm:$0xff]   ;;  %3395 = vmatprep.subr.bf16.mxu0 %v3849_v40  ;;  %v3852_v39 = vld [vmem:[%s4872_s0 + $0x38] sm:$0xff]   ;;  %v3289_v54 = vld [vmem:[%s5349_s24] ss:$0 sm:$0xff] }
 0x8c1   : > { %2576 = vmatprep.subr.bf16.mxu1 %v3821_v48  ;;  %v3895_v38 = vld [vmem:[#allocation19 + $0x10] sm:$0xff] (!%p3308_p2)   ;;  %v3896_v40 = vld [vmem:[#allocation19 + $0x18] sm:$0xff] (!%p3308_p2)  }
 0x8c2   : > { %2436 = vadd.xlane.f32.xlu0 %v5174_v44  ;;  %v2442_v26 = vmul.f32 %v5174_v44, %v5174_v44  ;;  %2577 = vmatpush1.bf16.msra.mxu1 %v3819_v49 }
 0x8c3   : > { %2578 = vmatprep.subr.bf16.mxu1 %v3824_v50  ;;  %3396 = vmatpush3.bf16.msra.mxu0 %v3850_v35  ;;  %v3897_v35 = vld [vmem:[#allocation19 + $0x20] sm:$0xff] (!%p3308_p2)  }
 0x8c4   : > { %2445 = vadd.xlane.f32.xlu1 %v2442_v26  ;;  %v2489_v26 = vrot.slane %v2480_v42, %v1155_v55 }
 0x8c6   : > { %2443 = vadd.xlane.f32.xlu0 %v2441_v47  ;;  %2579 = vmatpush1.bf16.msra.mxu1 %v3822_v51 }
 0x8c7   : > { %2580 = vmatprep.subr.bf16.mxu1 %v3827_v52 }
 0x8ca   : > { %2581 = vmatpush1.bf16.msra.mxu1 %v3825_v53 }
 0x8cb   : > { %2582 = vmatprep.subr.bf16.mxu1 %v3830_v56 }
 0x8ce   : > { %2583 = vmatpush1.bf16.msra.mxu1 %v3828_v58 }
 0x8cf   : > { %2584 = vmatprep.subr.bf16.mxu1 %v3833_v59 }
 0x8d2   : > { %2585 = vmatpush1.bf16.msra.mxu1 %v3831_v60 }
 0x8d3   : > { %2586 = vmatprep.subr.bf16.mxu1 %v3836_v62 }
 0x8d6   : > { %2587 = vmatpush1.bf16.msra.mxu1 %v3834_v63 }
 0x94d   : > { %v2435_v12 = vpop.xlane.xlu1 %2434 }
 0x94e   : > { %v2439_v14 = vmul.f32 0.0078125, %v2435_v12 }
 0x94f   : > { %v2437_v13 = vpop.xlane.xlu0 %2436 }
 0x950   : > { %v2440_v10 = vmul.f32 0.0078125, %v2437_v13  ;;  %v2449_v19 = vmul.f32 %v2439_v14, %v2439_v14  ;;  %v2453_v30 = vsub.f32 %v5171_v41, %v2439_v14  ;;  %v3851_v41 = vld [vmem:[%s4872_s0 + $0x78] sm:$0xff]  }
 0x951   : > { %v2446_v15 = vpop.xlane.xlu1 %2445  ;;  %3397 = vmatprep.subr.bf16.mxu0 %v3851_v41  ;;  %v3898_v41 = vld [vmem:[#allocation19 + $0x28] sm:$0xff] (!%p3308_p2)  }
 0x952   : > { %v2450_v17 = vmul.f32 %v2440_v10, %v2440_v10  ;;  %v2448_v27 = vmul.f32 0.0078125, %v2446_v15  ;;  %v2454_v25 = vsub.f32 %v5174_v44, %v2440_v10  ;;  %3398 = vmatpush3.bf16.msra.mxu0 %v3852_v39  ;;  %v2485_v44 = vrot.slane %v2480_v42, %v1151_v57  ;;  %v3899_v39 = vld [vmem:[#allocation19 + $0x30] sm:$0xff] (!%p3308_p2)   ;;  %v3900_v42 = vld [vmem:[#allocation19 + $0x38] sm:$0xff] (!%p3308_p2)  }
 0x953   : > { %v2444_v18 = vpop.xlane.xlu0 %2443 }
 0x954   : > { %v2452_v20 = vsub.f32 %v2448_v27, %v2450_v17  ;;  %v2447_v16 = vmul.f32 0.0078125, %v2444_v18 }
 0x956   : > { %v2456_v21 = vadd.f32 1e-05, %v2452_v20  ;;  %v2451_v22 = vsub.f32 %v2447_v16, %v2449_v19 }
 0x958   : > { %3885 = vrsqrt.f32 %v2456_v21  ;;  %v2455_v23 = vadd.f32 1e-05, %v2451_v22 }
 0x95a   : > { %3887 = vrsqrt.f32 %v2455_v23 }
 0x962   : > { %v3886_v28 = vpop.eup %3885 }
 0x963   : > { %v2460_v31 = vmul.f32 %v3886_v28, %v2454_v25  ;;  %v3306_v25 = vld [vmem:[%s915_s1] ss:$0 sm:$0xff]  ;;  %s5353_s1 = sld [smem:[#allocation40_spill]] (!%p3308_p2) }
 0x964   : > { %v3888_v32 = vpop.eup %3887 }
 0x965   : > { %v2459_v33 = vmul.f32 %v3888_v32, %v2453_v30  ;;  %v2469_v24 = vmul.f32 %v3271_v29, %v2460_v31  ;;  %v3307_v31 = vld [vmem:[%s5351_s4] ss:$0 sm:$0xff] }
 0x967   : > { %v2468_v36 = vmul.f32 %v3271_v29, %v2459_v33  ;;  %v2478_v43 = vadd.f32 %v3272_v34, %v2469_v24 }
 0x969   : > { %v2477_v37 = vadd.f32 %v3272_v34, %v2468_v36 }
 0x96b   : > { %v2479_v61 = vpack.c.bf16 %v2478_v43, %v2477_v37 }
 0x96d   : > { %2605 = vmatmul.mubr.bf16.vlgmr.msra.gmra.mrb[44].mxu1 %v2479_v61  ;;  %v3894_v61 = vld [vmem:[#allocation19 + $0x8] sm:$0xff] (!%p3308_p2)  }
 0xa40   : > { %v2606_v47 = vpop.f32.mrb[44].mxu1 }
 0xa41   : > { %v2607_v45 = vadd.f32 %v2606_v47, %v2485_v44  ;;  %v2608_v46 = vpop.f32.mrb[45].mxu1 }
 0xa42   : > { %v2609_v48 = vadd.f32 %v2608_v46, %v2489_v26  ;;  %v2610_v49 = vpop.f32.mrb[46].mxu1 }
 0xa43   : > { %v2611_v50 = vadd.f32 %v2610_v49, %v2485_v44  ;;  %v2612_v51 = vpop.f32.mrb[47].mxu1  ;;  %v2615_v53 = vmax.f32 %v2607_v45, 0.0 }
 0xa44   : > { %v2613_v52 = vadd.f32 %v2612_v51, %v2489_v26  ;;  %v2616_v58 = vmax.f32 %v2609_v48, 0.0  ;;  %v3309_v26 = vld [vmem:[%s5353_s1] ss:$0 sm:$0xff] (!%p3308_p2) }
 0xa45   : > { %v2617_v56 = vmax.f32 %v2611_v50, 0.0 }
 0xa46   : > { %v2618_v59 = vmax.f32 %v2613_v52, 0.0 }
 0xa47   : > { %v2619_v60 = vpack.c.bf16 %v2617_v56, %v2615_v53 }
 0xa48   : > { %v2620_v62 = vpack.c.bf16 %v2618_v59, %v2616_v58 }
 0xa4a   : > { %2756 = vmatprep.mubr.bf16.mxu0 %v2620_v62 }
 0xa4b   : > { %2757 = vmatmul.mubr.bf16.vlgmr.msra.gmra.mrb[32].mxu0 %v2619_v60 }
 0xb1e   : > { %v3399_v57 = vpop.f32.mrb[32].mxu0 }
 0xb1f   : > { %v3400_v55 = vpop.f32.mrb[33].mxu0 }
 0xb20   : > { %v3401_v63 = vadd.f32 %v3400_v55, %v3399_v57  ;;  %v3402_v0 = vpop.f32.mrb[34].mxu0 }
 0xb21   : > { %v3403_v1 = vpop.f32.mrb[35].mxu0 }
 0xb22   : > { %v2759_v2 = vadd.f32 %v3401_v63, %v3289_v54  ;;  %v3404_v3 = vadd.f32 %v3403_v1, %v3402_v0 }
 0xb24   : > { %v2762_v5 = vadd.f32 %v3404_v3, %v3289_v54  ;;  %v2765_v6 = vadd.f32 %v2759_v2, %v2477_v37  ;;  %v3893_v37 = vld [vmem:[#allocation19] sm:$0xff] (!%p3308_p2)  }
 0xb26   : > { %2767 = vadd.xlane.f32.xlu0 %v2765_v6  ;;  %v2766_v7 = vadd.f32 %v2762_v5, %v2478_v43  ;;  %v2773_v8 = vmul.f32 %v2765_v6, %v2765_v6  ;;  %v4316_v43 = vmov (!%p3308_p2), 0.0  }
 0xb27   : > { %3570 = vmatprep.subr.bf16.mxu0 (!%p3308_p2), %v4316_v43  ;;  %3586 = vmatprep.mubr.msk.bf16.mxu0 (!%p3308_p2), %vm4317_vm10, %v4316_v43 }
 0xb28   : > { %2769 = vadd.xlane.f32.xlu1 %v2766_v7  ;;  %v2774_v9 = vmul.f32 %v2766_v7, %v2766_v7  ;;  %3571 = vmatpush3.bf16.msra.mxu0 (!%p3308_p2), %v3893_v37 }
 0xb29   : > { %3572 = vmatprep.subr.bf16.mxu0 (!%p3308_p2), %v4316_v43 }
 0xb2a   : > { %2775 = vadd.xlane.f32.xlu0 %v2773_v8 }
 0xb2c   : > { %2777 = vadd.xlane.f32.xlu1 %v2774_v9  ;;  %3573 = vmatpush3.bf16.msra.mxu0 (!%p3308_p2), %v3894_v61 }
 0xb2d   : > { %3574 = vmatprep.subr.bf16.mxu0 (!%p3308_p2), %v4316_v43 }
 0xb30   : > { %3575 = vmatpush3.bf16.msra.mxu0 (!%p3308_p2), %v3895_v38 }
 0xb31   : > { %3576 = vmatprep.subr.bf16.mxu0 (!%p3308_p2), %v4316_v43 }
 0xb34   : > { %3577 = vmatpush3.bf16.msra.mxu0 (!%p3308_p2), %v3896_v40 }
 0xb35   : > { %3578 = vmatprep.subr.bf16.mxu0 (!%p3308_p2), %v4316_v43 }
 0xb38   : > { %3579 = vmatpush3.bf16.msra.mxu0 (!%p3308_p2), %v3897_v35 }
 0xb39   : > { %3580 = vmatprep.subr.bf16.mxu0 (!%p3308_p2), %v4316_v43 }
 0xb3c   : > { %3581 = vmatpush3.bf16.msra.mxu0 (!%p3308_p2), %v3898_v41 }
 0xb3d   : > { %3582 = vmatprep.subr.bf16.mxu0 (!%p3308_p2), %v4316_v43 }
 0xb40   : > { %3583 = vmatpush3.bf16.msra.mxu0 (!%p3308_p2), %v3899_v39 }
 0xb41   : > { %3584 = vmatprep.subr.bf16.mxu0 (!%p3308_p2), %v4316_v43 }
 0xb44   : > { %3585 = vmatpush3.bf16.msra.mxu0 (!%p3308_p2), %v3900_v42 }
 0xbb3   : > { %v2768_v11 = vpop.xlane.xlu0 %2767 }
 0xbb4   : > { %v2771_v4 = vmul.f32 0.0078125, %v2768_v11 }
 0xbb5   : > { %v2770_v12 = vpop.xlane.xlu1 %2769 }
 0xbb6   : > { %v2772_v13 = vmul.f32 0.0078125, %v2770_v12  ;;  %v2781_v10 = vmul.f32 %v2771_v4, %v2771_v4  ;;  %v2785_v22 = vsub.f32 %v2765_v6, %v2771_v4 }
 0xbb7   : > { %v2776_v14 = vpop.xlane.xlu0 %2775 }
 0xbb8   : > { %v2779_v15 = vmul.f32 0.0078125, %v2776_v14  ;;  %v2782_v27 = vmul.f32 %v2772_v13, %v2772_v13  ;;  %v2786_v28 = vsub.f32 %v2766_v7, %v2772_v13 }
 0xbb9   : > { %v2778_v17 = vpop.xlane.xlu1 %2777 }
 0xbba   : > { %v2783_v18 = vsub.f32 %v2779_v15, %v2781_v10  ;;  %v2780_v19 = vmul.f32 0.0078125, %v2778_v17 }
 0xbbc   : > { %v2787_v20 = vadd.f32 1e-05, %v2783_v18  ;;  %v2784_v16 = vsub.f32 %v2780_v19, %v2782_v27 }
 0xbbe   : > { %3889 = vrsqrt.f32 %v2787_v20  ;;  %v2788_v21 = vadd.f32 1e-05, %v2784_v16 }
 0xbc0   : > { %3891 = vrsqrt.f32 %v2788_v21 }
 0xbc8   : > { %v3890_v23 = vpop.eup %3889 }
 0xbc9   : > { %v2791_v29 = vmul.f32 %v3890_v23, %v2785_v22 }
 0xbca   : > { %v3892_v30 = vpop.eup %3891 }
 0xbcb   : > { %v2800_v32 = vmul.f32 %v3306_v25, %v2791_v29  ;;  %v2792_v33 = vmul.f32 %v3892_v30, %v2786_v28  ;;  %2816 = sbr.rel (%p3308_p2) target bundleno = 3244 (0xcac), region = 140 }
 0xbcd   : > { %v2809_v24 = vadd.f32 %v3307_v31, %v2800_v32  ;;  %v2801_v34 = vmul.f32 %v3306_v25, %v2792_v33 }
 0xbcf   : > { %2811 = vst [vmem:[#allocation2] sm:$0xff] %v2809_v24  ;;  %v2810_v36 = vadd.f32 %v3307_v31, %v2801_v34 }
 0xbd1   : > { %2812 = vst [vmem:[#allocation2 + $0x8] sm:$0xff] %v2810_v36  ;;  %v2817_v44 = vpack.c.bf16 (!%p3308_p2), %v2810_v36, %v2809_v24 }
 0xbd3   : > { %3587 = vmatmul.mubr.bf16.vlgmr.msra.gmra.mrb[0].mxu0 %v2817_v44 }
 0xca6   : > { %v2923_v47 = vpop.f32.mrb[0].mxu0 }
 0xca7   : > { %v2924_v45 = vadd.f32 %v3309_v26, %v2923_v47  ;;  %v3588_v46 = vpop.f32.mrb[1].mxu0 }
 0xca8   : > { %v2926_v48 = vpop.f32.mrb[2].mxu0 }
 0xca9   : > { %2930 = vst [vmem:[%s5354_s21] sm:$0xff] %v2924_v45  ;;  %v2927_v49 = vadd.f32 %v3309_v26, %v2926_v48  ;;  %v3589_v50 = vpop.f32.mrb[3].mxu0 }
 0xcab   : > { %2931 = vst [vmem:[%s5354_s21 + $0x8] sm:$0xff] %v2927_v49 }
 0xcac PF: > { %s5355_s27 = sld [smem:[#allocation29_spill]]  ;;  %s5356_s3 = sld [smem:[#allocation27_spill]] }
 0xcad   : > { %s5357_s26 = sld [smem:[#allocation30_spill]]  ;;  %s5358_s24 = smov %s4279_s25 }
 0xcb2   : > { %p42_p6 = scmp.ge.s32.totalorder %s5355_s27, 4   ;;  %s5359_s25 = smov %s5356_s3 }
 0xcb4   :  { %44 = sbr.rel (!%p42_p6) target bundleno = 24 (0x18), region = 251 }
 0xcbb   :  { %2943 = vsyncpa [#allocation4], 1 }
 0xcbc   :  { %2945 = vsyncpa [#allocation4 + $0x1], 1 }
 0xcbd   :  { %2946 = vsyncpa [#allocation6], 1 }
 0xcbe   :  { %2948 = vsyncpa [#allocation6 + $0x1], 1 }
 0xcbf   :  { %2949 = vsyncpa [#allocation9], 1 }
 0xcc0   :  { %2951 = vsyncpa [#allocation9 + $0x1], 1 }
 0xcc1   :  { %2952 = vsyncpa [#allocation12], 1 }
 0xcc2   :  { %2954 = vsyncpa [#allocation12 + $0x1], 1 }
 0xcc3   :  { %2955 = vsyncpa [#allocation15], 1 }
 0xcc4   :  { %2957 = vsyncpa [#allocation15 + $0x1], 1 }
 0xcc5   :  { %2958 = vsyncpa [#allocation18], 1 }
 0xcc6   :  { %2960 = vsyncpa [#allocation18 + $0x1], 1 }

</bundles_post_ra>
